<compile_context>
chip_gen: v7x
topology: tpu7x:2x2x1
jax: 0.10.0
libtpu: 0.0.40
codegen_flags: <defaults>
</compile_context>

<pallas_src>
import jax
import jax.numpy as jnp
from jax import lax
from jax.experimental import pallas as pl
from jax.experimental.pallas import tpu as pltpu


# --------------------------------------------------------------------------
# Fused Pallas kernel: conv1+ReLU -> maxpool2x2 -> conv2+ReLU -> Gram
# --------------------------------------------------------------------------
def _fused_gram_kernel(im1_ref, w1_ref, b1_ref, w2_ref, b2_ref, gram_ref,
                       p2_ref):
    # im1_ref : (Bt*H*W, K1P) bf16  conv1 im2col, rows ordered (b, ph, pw, hp, wp)
    # w1_ref  : (K1P, C1)     bf16  conv1 taps flattened along K (dy, dx, ci)
    # b1_ref  : (1, C1)       f32
    # w2_ref  : (9, C1, C2)   bf16  conv2 taps, k = dy*3 + dx
    # b2_ref  : (1, C2)       f32
    # gram_ref: (Bt, C1, C2)  f32   output Gram matrices
    # p2_ref  : (Bt, Hp+2, Wp+2, C1) f32  zero-padded pooled map (VMEM scratch)
    Bt = gram_ref.shape[0]
    C1 = w1_ref.shape[1]
    C2 = w2_ref.shape[2]
    Hp = p2_ref.shape[1] - 2
    Wp = p2_ref.shape[2] - 2
    HWp = Hp * Wp
    HW = 4 * HWp

    # ---------------- conv1 + ReLU: one MXU matmul ------------------------
    f1 = jnp.dot(im1_ref[...], w1_ref[...],
                 preferred_element_type=jnp.float32)
    f1 = jnp.maximum(f1 + b1_ref[...], 0.0)                  # (Bt*HW, C1) f32

    # ---------------- 2x2 pooling (max for conv2, sum for gram) -----------
    # Rows are ordered (b, ph, pw, hp, wp): each 2x2 corner is a contiguous
    # row block -> pure VPU max / add on value slices.
    f1c = f1.reshape(Bt, 4, HWp, C1)
    c00, c01, c10, c11 = f1c[:, 0], f1c[:, 1], f1c[:, 2], f1c[:, 3]
    pool_max = jnp.maximum(jnp.maximum(c00, c01), jnp.maximum(c10, c11))
    pool_sum = (c00 + c01) + (c10 + c11)   # sum-pool: upsample-free Gram identity

    # ---------------- conv2 + ReLU on the max-pooled map -------------------
    # Zero-fill every step (batch axis is "parallel": a pid==0-only init is
    # not megacore-safe); interior overwritten right after.
    p2_ref[...] = jnp.zeros(p2_ref.shape, p2_ref.dtype)
    p2_ref[:, 1:Hp + 1, 1:Wp + 1, :] = pool_max.reshape(Bt, Hp, Wp, C1)

    f2 = jnp.zeros((Bt * HWp, C2), jnp.float32)
    for k in range(9):                       # 9 accumulating tap matmuls (K=C1)
        dy, dx = k // 3, k % 3
        tap = p2_ref[:, dy:dy + Hp, dx:dx + Wp, :].reshape(Bt * HWp, C1)
        f2 = f2 + jnp.dot(tap.astype(jnp.bfloat16), w2_ref[k],
                          preferred_element_type=jnp.float32)
    f2 = jnp.maximum(f2 + b2_ref[...], 0.0).reshape(Bt, HWp, C2)

    # ---------------- Gram: sumpool2x2(f1)^T @ f2 / (H*W) ------------------
    #   == f1 . upsample2x(f2)^T / (H*W)   (exact for finite values)
    inv_hw = 1.0 / float(HW)
    ps16 = pool_sum.astype(jnp.bfloat16)
    f216 = f2.astype(jnp.bfloat16)
    for bb in range(Bt):
        g = lax.dot_general(ps16[bb], f216[bb], (((0,), (0,)), ((), ())),
                            preferred_element_type=jnp.float32)  # (C1, C2)
        gram_ref[bb] = g * inv_hw


# --------------------------------------------------------------------------
# Wrapper (single pallas_call, grid over batch blocks)
# --------------------------------------------------------------------------
@jax.jit
def svgg17_gram_direct_stage1(x_nchw, w1_hwio, b1, w2_hwio, b2):
    x = jnp.transpose(x_nchw, (0, 2, 3, 1)).astype(jnp.float32)  # NCHW -> NHWC
    B, H, W, Cin = x.shape
    assert H % 2 == 0 and W % 2 == 0, "2x2 pooling / Gram identity need even H, W"
    C1 = w1_hwio.shape[-1]
    C2 = w2_hwio.shape[-1]
    Hp, Wp = H // 2, W // 2
    HW = H * W
    K1 = 9 * Cin
    K1P = 32 if K1 <= 32 else pl.cdiv(K1, 128) * 128      # padded contraction dim

    # Batch block: stack Bt images along the matmul M axis; keep >= 2 grid
    # steps when possible so megacore parts can split the "parallel" axis.
    if B % 4 == 0 and B >= 8:
        Bt = 4
    elif B % 2 == 0:
        Bt = 2
    else:
        Bt = 1

    # conv1 im2col in XLA (once, in HBM): taps in (dy, dx, ci) order, rows
    # reordered to (b, ph, pw, hp, wp) so in-kernel 2x2 pooling is contiguous.
    xp = jnp.pad(x, ((0, 0), (1, 1), (1, 1), (0, 0)))
    taps = [xp[:, dy:dy + H, dx:dx + W, :] for dy in range(3) for dx in range(3)]
    patches = jnp.concatenate(taps, axis=-1)                     # (B, H, W, 9*Cin)
    patches = patches.reshape(B, Hp, 2, Wp, 2, K1)
    patches = jnp.transpose(patches, (0, 2, 4, 1, 3, 5))         # (B, 2, 2, Hp, Wp, K1)
    im1 = patches.reshape(B * HW, K1)
    im1 = jnp.pad(im1, ((0, 0), (0, K1P - K1))).astype(jnp.bfloat16)

    # Weights: tap-concatenated; bf16 for the MXU (f32 accumulation in-kernel).
    w1 = jnp.pad(w1_hwio.reshape(K1, C1),
                 ((0, K1P - K1), (0, 0))).astype(jnp.bfloat16)
    w2 = w2_hwio.reshape(9, C1, C2).astype(jnp.bfloat16)
    b1_2d = b1.reshape(1, C1).astype(jnp.float32)
    b2_2d = b2.reshape(1, C2).astype(jnp.float32)

    grid_spec = pltpu.PrefetchScalarGridSpec(
        num_scalar_prefetch=0,
        grid=(B // Bt,),
        in_specs=[
            pl.BlockSpec((Bt * HW, K1P), lambda i: (i, 0)),      # conv1 im2col block
            pl.BlockSpec((K1P, C1), lambda i: (0, 0)),           # w1 (constant)
            pl.BlockSpec((1, C1), lambda i: (0, 0)),             # b1 (constant)
            pl.BlockSpec((9, C1, C2), lambda i: (0, 0, 0)),      # w2 (constant)
            pl.BlockSpec((1, C2), lambda i: (0, 0)),             # b2 (constant)
        ],
        out_specs=pl.BlockSpec((Bt, C1, C2), lambda i: (i, 0, 0)),  # lane-dense (C2=128)
        scratch_shapes=[
            pltpu.VMEM((Bt, Hp + 2, Wp + 2, C1), jnp.float32),   # padded pooled map
        ],
    )
    return pl.pallas_call(
        _fused_gram_kernel,
        out_shape=jax.ShapeDtypeStruct((B, C1, C2), jnp.float32),
        grid_spec=grid_spec,
        compiler_params=pltpu.CompilerParams(
            dimension_semantics=("parallel",)),  # batch blocks over 2 TCs on v7x
    )(im1, w1, b1_2d, w2, b2_2d)


# --------------------------------------------------------------------------
# Module equivalent
# --------------------------------------------------------------------------
class SVGG17BackwardPallas:
    """SVGG17_BACKWARD(dataSet, 'gram_direct', Stage=1) forward in Pallas."""

    def __init__(self, key):
        k1, k2, k3, k4 = jax.random.split(key, 4)
        # features1: Conv2d(3, 64, 3, pad=1) + ReLU   (weights stored HWIO)
        self.w1 = jax.random.normal(k1, (3, 3, 3, 64), jnp.float32) * 0.1
        self.b1 = jax.random.normal(k2, (64,), jnp.float32) * 0.01
        # features2: MaxPool(2,2) -> Conv2d(64, 128, 3, pad=1) + ReLU
        self.w2 = jax.random.normal(k3, (3, 3, 64, 128), jnp.float32) * 0.05
        self.b2 = jax.random.normal(k4, (128,), jnp.float32) * 0.01

    def forward(self, x_nchw):
        gram = svgg17_gram_direct_stage1(x_nchw, self.w1, self.b1,
                                         self.w2, self.b2)      # (B, 64, 128)
        return [gram]                                           # gram_direct returns a list


# --------------------------------------------------------------------------
# Pure-JAX reference (for verification)
# --------------------------------------------------------------------------
def reference_forward(x_nchw, model):
    def conv(x, w_hwio, b):
        w_oihw = jnp.transpose(w_hwio, (3, 2, 0, 1))
        y = lax.conv_general_dilated(
            x, w_oihw, (1, 1), "SAME",
            dimension_numbers=("NCHW", "OIHW", "NCHW"),
            precision=lax.Precision.HIGHEST)
        return jax.nn.relu(y + b[None, :, None, None])

    f1 = conv(x_nchw, model.w1, model.b1)                        # (B,64,16,16)
    p = lax.reduce_window(f1, -jnp.inf, lax.max,
                          (1, 1, 2, 2), (1, 1, 2, 2), "VALID")   # (B,64,8,8)
    f2 = conv(p, model.w2, model.b2)                             # (B,128,8,8)
    # create_Gram_mat: both spatial dims differ -> nearest-upsample f2 by 2.
    f2u = jnp.repeat(jnp.repeat(f2, 2, axis=2), 2, axis=3)       # (B,128,16,16)
    B, n, H, W = f1.shape
    m = f2u.shape[1]
    g = jnp.einsum("bnp,bmp->bnm",
                   f1.reshape(B, n, H * W), f2u.reshape(B, m, H * W),
                   precision=lax.Precision.HIGHEST) / (H * W)
    return g


# --------------------------------------------------------------------------
if __name__ == "__main__":
    key = jax.random.PRNGKey(0)
    key_model, key_x = jax.random.split(key)
    model = SVGG17BackwardPallas(key_model)

    x = jax.random.normal(key_x, (2, 3, 16, 16), jnp.float32)    # NCHW, like PyTorch

    gram_list = model.forward(x)
    gram = jax.block_until_ready(gram_list[0])

    ref = jax.block_until_ready(reference_forward(x, model))
    assert gram.shape == (2, 64, 128), gram.shape
    max_err = float(jnp.max(jnp.abs(gram - ref)))
    assert max_err < 5e-3, max_err

    print("KERNEL_OK")
</pallas_src>

<mosaic_0001>
module attributes {stable_mosaic.version = 11 : i64} {
  func.func @_fused_gram_kernel(%arg0: i32, %arg1: memref<512x32xbf16, #tpu.memory_space<vmem>>, %arg2: memref<32x64xbf16, #tpu.memory_space<vmem>>, %arg3: memref<1x64xf32, #tpu.memory_space<vmem>>, %arg4: memref<9x64x128xbf16, #tpu.memory_space<vmem>>, %arg5: memref<1x128xf32, #tpu.memory_space<vmem>>, %arg6: memref<2x64x128xf32, #tpu.memory_space<vmem>>, %arg7: memref<2x10x10x64xf32, #tpu.memory_space<vmem>>) attributes {dimension_semantics = [#tpu.dimension_semantics<parallel>], iteration_bounds = array<i64: 1>, scalar_prefetch = 0 : i64, scratch_operands = 1 : i64, tpu.core_type = #tpu.core_type<tc>, window_params = [{transform_indices = @transform_0, window_bounds = array<i64: 512, 32>}, {pipeline_mode = #tpu.pipeline_mode<synchronous>, transform_indices = @transform_1, window_bounds = array<i64: 32, 64>}, {pipeline_mode = #tpu.pipeline_mode<synchronous>, transform_indices = @transform_2, window_bounds = array<i64: 1, 64>}, {pipeline_mode = #tpu.pipeline_mode<synchronous>, transform_indices = @transform_3, window_bounds = array<i64: 9, 64, 128>}, {pipeline_mode = #tpu.pipeline_mode<synchronous>, transform_indices = @transform_4, window_bounds = array<i64: 1, 128>}, {transform_indices = @transform_5, window_bounds = array<i64: 2, 64, 128>}]} {
    %c0 = arith.constant 0 : index
    %c0_0 = arith.constant 0 : index
    %0 = vector.load %arg1[%c0, %c0_0] : memref<512x32xbf16, #tpu.memory_space<vmem>>, vector<512x32xbf16>
    %c0_1 = arith.constant 0 : index
    %c0_2 = arith.constant 0 : index
    %1 = vector.load %arg2[%c0_1, %c0_2] : memref<32x64xbf16, #tpu.memory_space<vmem>>, vector<32x64xbf16>
    %cst = arith.constant dense<0.000000e+00> : vector<512x64xf32>
    %2 = tpu.matmul %0, %1, %cst {dimension_numbers = #tpu.dot_dimension_numbers<[1], [0], [0], [1], [0, 0, 1, 1], [], []>} : vector<512x32xbf16>, vector<32x64xbf16>, vector<512x64xf32> -> vector<512x64xf32>
    %c0_3 = arith.constant 0 : index
    %c0_4 = arith.constant 0 : index
    %3 = vector.load %arg3[%c0_3, %c0_4] : memref<1x64xf32, #tpu.memory_space<vmem>>, vector<1x64xf32>
    %4 = vector.broadcast %3 : vector<1x64xf32> to vector<512x64xf32>
    %5 = arith.addf %2, %4 : vector<512x64xf32>
    %cst_5 = arith.constant 0.000000e+00 : f32
    %6 = vector.broadcast %cst_5 : f32 to vector<512x64xf32>
    %7 = arith.maximumf %5, %6 : vector<512x64xf32>
    %8 = vector.shape_cast %7 : vector<512x64xf32> to vector<2x4x64x64xf32>
    %9 = vector.extract_strided_slice %8 {offsets = [0, 0, 0, 0], sizes = [2, 1, 64, 64], strides = [1, 1, 1, 1]} : vector<2x4x64x64xf32> to vector<2x1x64x64xf32>
    %10 = vector.shape_cast %9 : vector<2x1x64x64xf32> to vector<2x64x64xf32>
    %11 = vector.extract_strided_slice %8 {offsets = [0, 1, 0, 0], sizes = [2, 1, 64, 64], strides = [1, 1, 1, 1]} : vector<2x4x64x64xf32> to vector<2x1x64x64xf32>
    %12 = vector.shape_cast %11 : vector<2x1x64x64xf32> to vector<2x64x64xf32>
    %13 = vector.extract_strided_slice %8 {offsets = [0, 2, 0, 0], sizes = [2, 1, 64, 64], strides = [1, 1, 1, 1]} : vector<2x4x64x64xf32> to vector<2x1x64x64xf32>
    %14 = vector.shape_cast %13 : vector<2x1x64x64xf32> to vector<2x64x64xf32>
    %15 = vector.extract_strided_slice %8 {offsets = [0, 3, 0, 0], sizes = [2, 1, 64, 64], strides = [1, 1, 1, 1]} : vector<2x4x64x64xf32> to vector<2x1x64x64xf32>
    %16 = vector.shape_cast %15 : vector<2x1x64x64xf32> to vector<2x64x64xf32>
    %17 = arith.maximumf %10, %12 : vector<2x64x64xf32>
    %18 = arith.maximumf %14, %16 : vector<2x64x64xf32>
    %19 = arith.maximumf %17, %18 : vector<2x64x64xf32>
    %20 = arith.addf %10, %12 : vector<2x64x64xf32>
    %21 = arith.addf %14, %16 : vector<2x64x64xf32>
    %22 = arith.addf %20, %21 : vector<2x64x64xf32>
    %cst_6 = arith.constant 0.000000e+00 : f32
    %23 = vector.broadcast %cst_6 : f32 to vector<2x10x10x64xf32>
    %c0_7 = arith.constant 0 : index
    %c0_8 = arith.constant 0 : index
    %c0_9 = arith.constant 0 : index
    %c0_10 = arith.constant 0 : index
    %24 = vector.load %arg7[%c0_7, %c0_8, %c0_9, %c0_10] : memref<2x10x10x64xf32, #tpu.memory_space<vmem>>, vector<2x10x10x64xf32>
    tpu.vector_store %arg7[%c0_7, %c0_8, %c0_9, %c0_10], %23 {strides = array<i32>} : memref<2x10x10x64xf32, #tpu.memory_space<vmem>>, vector<2x10x10x64xf32>,
    %25 = vector.shape_cast %19 : vector<2x64x64xf32> to vector<2x8x8x64xf32>
    %c0_11 = arith.constant 0 : index
    %c1 = arith.constant 1 : index
    %c1_12 = arith.constant 1 : index
    %c0_13 = arith.constant 0 : index
    %26 = vector.load %arg7[%c0_11, %c1, %c1_12, %c0_13] : memref<2x10x10x64xf32, #tpu.memory_space<vmem>>, vector<2x8x8x64xf32>
    tpu.vector_store %arg7[%c0_11, %c1, %c1_12, %c0_13], %25 {strides = array<i32>} : memref<2x10x10x64xf32, #tpu.memory_space<vmem>>, vector<2x8x8x64xf32>,
    %cst_14 = arith.constant 0.000000e+00 : f32
    %27 = vector.broadcast %cst_14 : f32 to vector<128x128xf32>
    %c0_15 = arith.constant 0 : index
    %c0_16 = arith.constant 0 : index
    %c0_17 = arith.constant 0 : index
    %c0_18 = arith.constant 0 : index
    %28 = vector.load %arg7[%c0_15, %c0_16, %c0_17, %c0_18] : memref<2x10x10x64xf32, #tpu.memory_space<vmem>>, vector<2x8x8x64xf32>
    %29 = vector.shape_cast %28 : vector<2x8x8x64xf32> to vector<128x64xf32>
    %30 = arith.truncf %29 : vector<128x64xf32> to vector<128x64xbf16>
    %c0_19 = arith.constant 0 : index
    %c0_20 = arith.constant 0 : index
    %c0_21 = arith.constant 0 : index
    %31 = vector.load %arg4[%c0_19, %c0_20, %c0_21] : memref<9x64x128xbf16, #tpu.memory_space<vmem>>, vector<1x64x128xbf16>
    %32 = vector.shape_cast %31 : vector<1x64x128xbf16> to vector<64x128xbf16>
    %cst_22 = arith.constant dense<0.000000e+00> : vector<128x128xf32>
    %33 = tpu.matmul %30, %32, %cst_22 {dimension_numbers = #tpu.dot_dimension_numbers<[1], [0], [0], [1], [0, 0, 1, 1], [], []>} : vector<128x64xbf16>, vector<64x128xbf16>, vector<128x128xf32> -> vector<128x128xf32>
    %34 = arith.addf %27, %33 : vector<128x128xf32>
    %c0_23 = arith.constant 0 : index
    %c0_24 = arith.constant 0 : index
    %c1_25 = arith.constant 1 : index
    %c0_26 = arith.constant 0 : index
    %35 = vector.load %arg7[%c0_23, %c0_24, %c1_25, %c0_26] : memref<2x10x10x64xf32, #tpu.memory_space<vmem>>, vector<2x8x8x64xf32>
    %36 = vector.shape_cast %35 : vector<2x8x8x64xf32> to vector<128x64xf32>
    %37 = arith.truncf %36 : vector<128x64xf32> to vector<128x64xbf16>
    %c1_27 = arith.constant 1 : index
    %c0_28 = arith.constant 0 : index
    %c0_29 = arith.constant 0 : index
    %38 = vector.load %arg4[%c1_27, %c0_28, %c0_29] : memref<9x64x128xbf16, #tpu.memory_space<vmem>>, vector<1x64x128xbf16>
    %39 = vector.shape_cast %38 : vector<1x64x128xbf16> to vector<64x128xbf16>
    %cst_30 = arith.constant dense<0.000000e+00> : vector<128x128xf32>
    %40 = tpu.matmul %37, %39, %cst_30 {dimension_numbers = #tpu.dot_dimension_numbers<[1], [0], [0], [1], [0, 0, 1, 1], [], []>} : vector<128x64xbf16>, vector<64x128xbf16>, vector<128x128xf32> -> vector<128x128xf32>
    %41 = arith.addf %34, %40 : vector<128x128xf32>
    %c0_31 = arith.constant 0 : index
    %c0_32 = arith.constant 0 : index
    %c2 = arith.constant 2 : index
    %c0_33 = arith.constant 0 : index
    %42 = vector.load %arg7[%c0_31, %c0_32, %c2, %c0_33] : memref<2x10x10x64xf32, #tpu.memory_space<vmem>>, vector<2x8x8x64xf32>
    %43 = vector.shape_cast %42 : vector<2x8x8x64xf32> to vector<128x64xf32>
    %44 = arith.truncf %43 : vector<128x64xf32> to vector<128x64xbf16>
    %c2_34 = arith.constant 2 : index
    %c0_35 = arith.constant 0 : index
    %c0_36 = arith.constant 0 : index
    %45 = vector.load %arg4[%c2_34, %c0_35, %c0_36] : memref<9x64x128xbf16, #tpu.memory_space<vmem>>, vector<1x64x128xbf16>
    %46 = vector.shape_cast %45 : vector<1x64x128xbf16> to vector<64x128xbf16>
    %cst_37 = arith.constant dense<0.000000e+00> : vector<128x128xf32>
    %47 = tpu.matmul %44, %46, %cst_37 {dimension_numbers = #tpu.dot_dimension_numbers<[1], [0], [0], [1], [0, 0, 1, 1], [], []>} : vector<128x64xbf16>, vector<64x128xbf16>, vector<128x128xf32> -> vector<128x128xf32>
    %48 = arith.addf %41, %47 : vector<128x128xf32>
    %c0_38 = arith.constant 0 : index
    %c1_39 = arith.constant 1 : index
    %c0_40 = arith.constant 0 : index
    %c0_41 = arith.constant 0 : index
    %49 = vector.load %arg7[%c0_38, %c1_39, %c0_40, %c0_41] : memref<2x10x10x64xf32, #tpu.memory_space<vmem>>, vector<2x8x8x64xf32>
    %50 = vector.shape_cast %49 : vector<2x8x8x64xf32> to vector<128x64xf32>
    %51 = arith.truncf %50 : vector<128x64xf32> to vector<128x64xbf16>
    %c3 = arith.constant 3 : index
    %c0_42 = arith.constant 0 : index
    %c0_43 = arith.constant 0 : index
    %52 = vector.load %arg4[%c3, %c0_42, %c0_43] : memref<9x64x128xbf16, #tpu.memory_space<vmem>>, vector<1x64x128xbf16>
    %53 = vector.shape_cast %52 : vector<1x64x128xbf16> to vector<64x128xbf16>
    %cst_44 = arith.constant dense<0.000000e+00> : vector<128x128xf32>
    %54 = tpu.matmul %51, %53, %cst_44 {dimension_numbers = #tpu.dot_dimension_numbers<[1], [0], [0], [1], [0, 0, 1, 1], [], []>} : vector<128x64xbf16>, vector<64x128xbf16>, vector<128x128xf32> -> vector<128x128xf32>
    %55 = arith.addf %48, %54 : vector<128x128xf32>
    %c0_45 = arith.constant 0 : index
    %c1_46 = arith.constant 1 : index
    %c1_47 = arith.constant 1 : index
    %c0_48 = arith.constant 0 : index
    %56 = vector.load %arg7[%c0_45, %c1_46, %c1_47, %c0_48] : memref<2x10x10x64xf32, #tpu.memory_space<vmem>>, vector<2x8x8x64xf32>
    %57 = vector.shape_cast %56 : vector<2x8x8x64xf32> to vector<128x64xf32>
    %58 = arith.truncf %57 : vector<128x64xf32> to vector<128x64xbf16>
    %c4 = arith.constant 4 : index
    %c0_49 = arith.constant 0 : index
    %c0_50 = arith.constant 0 : index
    %59 = vector.load %arg4[%c4, %c0_49, %c0_50] : memref<9x64x128xbf16, #tpu.memory_space<vmem>>, vector<1x64x128xbf16>
    %60 = vector.shape_cast %59 : vector<1x64x128xbf16> to vector<64x128xbf16>
    %cst_51 = arith.constant dense<0.000000e+00> : vector<128x128xf32>
    %61 = tpu.matmul %58, %60, %cst_51 {dimension_numbers = #tpu.dot_dimension_numbers<[1], [0], [0], [1], [0, 0, 1, 1], [], []>} : vector<128x64xbf16>, vector<64x128xbf16>, vector<128x128xf32> -> vector<128x128xf32>
    %62 = arith.addf %55, %61 : vector<128x128xf32>
    %c0_52 = arith.constant 0 : index
    %c1_53 = arith.constant 1 : index
    %c2_54 = arith.constant 2 : index
    %c0_55 = arith.constant 0 : index
    %63 = vector.load %arg7[%c0_52, %c1_53, %c2_54, %c0_55] : memref<2x10x10x64xf32, #tpu.memory_space<vmem>>, vector<2x8x8x64xf32>
    %64 = vector.shape_cast %63 : vector<2x8x8x64xf32> to vector<128x64xf32>
    %65 = arith.truncf %64 : vector<128x64xf32> to vector<128x64xbf16>
    %c5 = arith.constant 5 : index
    %c0_56 = arith.constant 0 : index
    %c0_57 = arith.constant 0 : index
    %66 = vector.load %arg4[%c5, %c0_56, %c0_57] : memref<9x64x128xbf16, #tpu.memory_space<vmem>>, vector<1x64x128xbf16>
    %67 = vector.shape_cast %66 : vector<1x64x128xbf16> to vector<64x128xbf16>
    %cst_58 = arith.constant dense<0.000000e+00> : vector<128x128xf32>
    %68 = tpu.matmul %65, %67, %cst_58 {dimension_numbers = #tpu.dot_dimension_numbers<[1], [0], [0], [1], [0, 0, 1, 1], [], []>} : vector<128x64xbf16>, vector<64x128xbf16>, vector<128x128xf32> -> vector<128x128xf32>
    %69 = arith.addf %62, %68 : vector<128x128xf32>
    %c0_59 = arith.constant 0 : index
    %c2_60 = arith.constant 2 : index
    %c0_61 = arith.constant 0 : index
    %c0_62 = arith.constant 0 : index
    %70 = vector.load %arg7[%c0_59, %c2_60, %c0_61, %c0_62] : memref<2x10x10x64xf32, #tpu.memory_space<vmem>>, vector<2x8x8x64xf32>
    %71 = vector.shape_cast %70 : vector<2x8x8x64xf32> to vector<128x64xf32>
    %72 = arith.truncf %71 : vector<128x64xf32> to vector<128x64xbf16>
    %c6 = arith.constant 6 : index
    %c0_63 = arith.constant 0 : index
    %c0_64 = arith.constant 0 : index
    %73 = vector.load %arg4[%c6, %c0_63, %c0_64] : memref<9x64x128xbf16, #tpu.memory_space<vmem>>, vector<1x64x128xbf16>
    %74 = vector.shape_cast %73 : vector<1x64x128xbf16> to vector<64x128xbf16>
    %cst_65 = arith.constant dense<0.000000e+00> : vector<128x128xf32>
    %75 = tpu.matmul %72, %74, %cst_65 {dimension_numbers = #tpu.dot_dimension_numbers<[1], [0], [0], [1], [0, 0, 1, 1], [], []>} : vector<128x64xbf16>, vector<64x128xbf16>, vector<128x128xf32> -> vector<128x128xf32>
    %76 = arith.addf %69, %75 : vector<128x128xf32>
    %c0_66 = arith.constant 0 : index
    %c2_67 = arith.constant 2 : index
    %c1_68 = arith.constant 1 : index
    %c0_69 = arith.constant 0 : index
    %77 = vector.load %arg7[%c0_66, %c2_67, %c1_68, %c0_69] : memref<2x10x10x64xf32, #tpu.memory_space<vmem>>, vector<2x8x8x64xf32>
    %78 = vector.shape_cast %77 : vector<2x8x8x64xf32> to vector<128x64xf32>
    %79 = arith.truncf %78 : vector<128x64xf32> to vector<128x64xbf16>
    %c7 = arith.constant 7 : index
    %c0_70 = arith.constant 0 : index
    %c0_71 = arith.constant 0 : index
    %80 = vector.load %arg4[%c7, %c0_70, %c0_71] : memref<9x64x128xbf16, #tpu.memory_space<vmem>>, vector<1x64x128xbf16>
    %81 = vector.shape_cast %80 : vector<1x64x128xbf16> to vector<64x128xbf16>
    %cst_72 = arith.constant dense<0.000000e+00> : vector<128x128xf32>
    %82 = tpu.matmul %79, %81, %cst_72 {dimension_numbers = #tpu.dot_dimension_numbers<[1], [0], [0], [1], [0, 0, 1, 1], [], []>} : vector<128x64xbf16>, vector<64x128xbf16>, vector<128x128xf32> -> vector<128x128xf32>
    %83 = arith.addf %76, %82 : vector<128x128xf32>
    %c0_73 = arith.constant 0 : index
    %c2_74 = arith.constant 2 : index
    %c2_75 = arith.constant 2 : index
    %c0_76 = arith.constant 0 : index
    %84 = vector.load %arg7[%c0_73, %c2_74, %c2_75, %c0_76] : memref<2x10x10x64xf32, #tpu.memory_space<vmem>>, vector<2x8x8x64xf32>
    %85 = vector.shape_cast %84 : vector<2x8x8x64xf32> to vector<128x64xf32>
    %86 = arith.truncf %85 : vector<128x64xf32> to vector<128x64xbf16>
    %c8 = arith.constant 8 : index
    %c0_77 = arith.constant 0 : index
    %c0_78 = arith.constant 0 : index
    %87 = vector.load %arg4[%c8, %c0_77, %c0_78] : memref<9x64x128xbf16, #tpu.memory_space<vmem>>, vector<1x64x128xbf16>
    %88 = vector.shape_cast %87 : vector<1x64x128xbf16> to vector<64x128xbf16>
    %cst_79 = arith.constant dense<0.000000e+00> : vector<128x128xf32>
    %89 = tpu.matmul %86, %88, %cst_79 {dimension_numbers = #tpu.dot_dimension_numbers<[1], [0], [0], [1], [0, 0, 1, 1], [], []>} : vector<128x64xbf16>, vector<64x128xbf16>, vector<128x128xf32> -> vector<128x128xf32>
    %90 = arith.addf %83, %89 : vector<128x128xf32>
    %c0_80 = arith.constant 0 : index
    %c0_81 = arith.constant 0 : index
    %91 = vector.load %arg5[%c0_80, %c0_81] : memref<1x128xf32, #tpu.memory_space<vmem>>, vector<1x128xf32>
    %92 = vector.broadcast %91 : vector<1x128xf32> to vector<128x128xf32>
    %93 = arith.addf %90, %92 : vector<128x128xf32>
    %cst_82 = arith.constant 0.000000e+00 : f32
    %94 = vector.broadcast %cst_82 : f32 to vector<128x128xf32>
    %95 = arith.maximumf %93, %94 : vector<128x128xf32>
    %96 = vector.shape_cast %95 : vector<128x128xf32> to vector<2x64x128xf32>
    %97 = arith.truncf %22 : vector<2x64x64xf32> to vector<2x64x64xbf16>
    %98 = arith.truncf %96 : vector<2x64x128xf32> to vector<2x64x128xbf16>
    %99 = vector.extract_strided_slice %97 {offsets = [0, 0, 0], sizes = [1, 64, 64], strides = [1, 1, 1]} : vector<2x64x64xbf16> to vector<1x64x64xbf16>
    %100 = vector.shape_cast %99 : vector<1x64x64xbf16> to vector<64x64xbf16>
    %101 = vector.extract_strided_slice %98 {offsets = [0, 0, 0], sizes = [1, 64, 128], strides = [1, 1, 1]} : vector<2x64x128xbf16> to vector<1x64x128xbf16>
    %102 = vector.shape_cast %101 : vector<1x64x128xbf16> to vector<64x128xbf16>
    %cst_83 = arith.constant dense<0.000000e+00> : vector<64x128xf32>
    %103 = tpu.matmul %100, %102, %cst_83 {dimension_numbers = #tpu.dot_dimension_numbers<[0], [0], [1], [1], [0, 1, 1, 1], [], []>} : vector<64x64xbf16>, vector<64x128xbf16>, vector<64x128xf32> -> vector<64x128xf32>
    %cst_84 = arith.constant 3.906250e-03 : f32
    %104 = vector.broadcast %cst_84 : f32 to vector<64x128xf32>
    %105 = arith.mulf %103, %104 : vector<64x128xf32>
    %c0_85 = arith.constant 0 : index
    %c0_86 = arith.constant 0 : index
    %c0_87 = arith.constant 0 : index
    %106 = vector.load %arg6[%c0_85, %c0_86, %c0_87] : memref<2x64x128xf32, #tpu.memory_space<vmem>>, vector<1x64x128xf32>
    %107 = vector.shape_cast %106 : vector<1x64x128xf32> to vector<64x128xf32>
    %108 = vector.shape_cast %105 : vector<64x128xf32> to vector<1x64x128xf32>
    tpu.vector_store %arg6[%c0_85, %c0_86, %c0_87], %108 {strides = array<i32>} : memref<2x64x128xf32, #tpu.memory_space<vmem>>, vector<1x64x128xf32>,
    %109 = vector.extract_strided_slice %97 {offsets = [1, 0, 0], sizes = [1, 64, 64], strides = [1, 1, 1]} : vector<2x64x64xbf16> to vector<1x64x64xbf16>
    %110 = vector.shape_cast %109 : vector<1x64x64xbf16> to vector<64x64xbf16>
    %111 = vector.extract_strided_slice %98 {offsets = [1, 0, 0], sizes = [1, 64, 128], strides = [1, 1, 1]} : vector<2x64x128xbf16> to vector<1x64x128xbf16>
    %112 = vector.shape_cast %111 : vector<1x64x128xbf16> to vector<64x128xbf16>
    %cst_88 = arith.constant dense<0.000000e+00> : vector<64x128xf32>
    %113 = tpu.matmul %110, %112, %cst_88 {dimension_numbers = #tpu.dot_dimension_numbers<[0], [0], [1], [1], [0, 1, 1, 1], [], []>} : vector<64x64xbf16>, vector<64x128xbf16>, vector<64x128xf32> -> vector<64x128xf32>
    %cst_89 = arith.constant 3.906250e-03 : f32
    %114 = vector.broadcast %cst_89 : f32 to vector<64x128xf32>
    %115 = arith.mulf %113, %114 : vector<64x128xf32>
    %c1_90 = arith.constant 1 : index
    %c0_91 = arith.constant 0 : index
    %c0_92 = arith.constant 0 : index
    %116 = vector.load %arg6[%c1_90, %c0_91, %c0_92] : memref<2x64x128xf32, #tpu.memory_space<vmem>>, vector<1x64x128xf32>
    %117 = vector.shape_cast %116 : vector<1x64x128xf32> to vector<64x128xf32>
    %118 = vector.shape_cast %115 : vector<64x128xf32> to vector<1x64x128xf32>
    tpu.vector_store %arg6[%c1_90, %c0_91, %c0_92], %118 {strides = array<i32>} : memref<2x64x128xf32, #tpu.memory_space<vmem>>, vector<1x64x128xf32>,
    return
  }
  func.func @transform_0(%arg0: i32) -> (i32, i32) {
    %c0_i32 = arith.constant 0 : i32
    %c0_i32_0 = arith.constant 0 : i32
    return %arg0, %c0_i32 : i32, i32
  }
  func.func @transform_1(%arg0: i32) -> (i32, i32) {
    %c0_i32 = arith.constant 0 : i32
    %c0_i32_0 = arith.constant 0 : i32
    %c0_i32_1 = arith.constant 0 : i32
    return %c0_i32, %c0_i32_0 : i32, i32
  }
  func.func @transform_2(%arg0: i32) -> (i32, i32) {
    %c0_i32 = arith.constant 0 : i32
    %c0_i32_0 = arith.constant 0 : i32
    %c0_i32_1 = arith.constant 0 : i32
    return %c0_i32, %c0_i32_0 : i32, i32
  }
  func.func @transform_3(%arg0: i32) -> (i32, i32, i32) {
    %c0_i32 = arith.constant 0 : i32
    %c0_i32_0 = arith.constant 0 : i32
    %c0_i32_1 = arith.constant 0 : i32
    %c0_i32_2 = arith.constant 0 : i32
    return %c0_i32, %c0_i32_0, %c0_i32_1 : i32, i32, i32
  }
  func.func @transform_4(%arg0: i32) -> (i32, i32) {
    %c0_i32 = arith.constant 0 : i32
    %c0_i32_0 = arith.constant 0 : i32
    %c0_i32_1 = arith.constant 0 : i32
    return %c0_i32, %c0_i32_0 : i32, i32
  }
  func.func @transform_5(%arg0: i32) -> (i32, i32, i32) {
    %c0_i32 = arith.constant 0 : i32
    %c0_i32_0 = arith.constant 0 : i32
    %c0_i32_1 = arith.constant 0 : i32
    return %arg0, %c0_i32, %c0_i32_0 : i32, i32, i32
  }
}

</mosaic_0001>

<bundles_post_ra>
// kernel: svgg17_gram_direct_stage1.1
= control target key start
LH: loop header
LB: loop body
LE: loop exit
PB: predicated region body
PF: predicated region fallthrough
CT: control target
= control target key end

     0   :  { %vm269_vm0 = vcmask 261120   ;;  %s4709_s0 = inlined_call_operand.vmem [shape: bf16[512,32], index: 0, kind: input, shape index: {}]   ;;  %s4710_s1 = inlined_call_operand.vmem [shape: bf16[32,64], index: 1, kind: input, shape index: {}]   ;;  %s4711_s2 = inlined_call_operand.vmem [shape: f32[1,64], index: 2, kind: input, shape index: {}]   ;;  %s4712_s3 = inlined_call_operand.vmem [shape: bf16[9,64,128], index: 3, kind: input, shape index: {}]   ;;  %s4713_s4 = inlined_call_operand.vmem [shape: f32[1,128], index: 4, kind: input, shape index: {}]   ;;  %s4714_s5 = inlined_call_operand.hbm [shape: f32[2,64,128], index: 5, kind: output, shape index: {}]  }
   0x1   :  { %v3733_v0 = vld [vmem:[%s4710_s1] sm:$0xff]   ;;  %v3734_v1 = vld [vmem:[%s4710_s1 + $0x8] sm:$0xff]   ;;  %v3737_v4 = vld [vmem:[%s4709_s0 + $0x10] sm:$0xff]  }
   0x2   :  { %3284 = vmatprep.subr.bf16.mxu0 %v3733_v0  ;;  %v3735_v2 = vld [vmem:[%s4709_s0] sm:$0xff]   ;;  %v3736_v3 = vld [vmem:[%s4709_s0 + $0x8] sm:$0xff]   ;;  %v3738_v5 = vld [vmem:[%s4709_s0 + $0x18] sm:$0xff]  }
   0x3   :  { %3285 = vmatpush3.bf16.msra.mxu0 %v3733_v0  ;;  %3288 = vmatprep.mubr.msk.bf16.mxu0 %vm269_vm0, %v3735_v2  ;;  %v3739_v6 = vld [vmem:[%s4709_s0 + $0x20] sm:$0xff]   ;;  %v3740_v7 = vld [vmem:[%s4709_s0 + $0x28] sm:$0xff]   ;;  %v3741_v8 = vld [vmem:[%s4709_s0 + $0x30] sm:$0xff]  }
   0x4   :  { %3286 = vmatprep.subr.bf16.mxu0 %v3734_v1  ;;  %v3742_v9 = vld [vmem:[%s4709_s0 + $0x38] sm:$0xff]   ;;  %v3743_v10 = vld [vmem:[%s4709_s0 + $0x40] sm:$0xff]   ;;  %v3744_v11 = vld [vmem:[%s4709_s0 + $0x48] sm:$0xff]  }
   0x5   :  { %v3745_v12 = vld [vmem:[%s4709_s0 + $0x50] sm:$0xff]   ;;  %v3746_v13 = vld [vmem:[%s4709_s0 + $0x58] sm:$0xff]   ;;  %v3747_v14 = vld [vmem:[%s4709_s0 + $0x60] sm:$0xff]  }
   0x6   :  { %v3748_v15 = vld [vmem:[%s4709_s0 + $0x68] sm:$0xff]   ;;  %v3749_v16 = vld [vmem:[%s4709_s0 + $0x70] sm:$0xff]  }
   0x7   :  { %3287 = vmatpush3.bf16.msra.mxu0 %v3734_v1 }
   0xa   :  { %3289 = vmatmul.mubr.msk.bf16.vlgmr.msra.gmra.mrb[0].mxu0 %vm269_vm0, %v3736_v3 }
   0xb   :  { %3292 = vmatprep.mubr.msk.bf16.mxu0 %vm269_vm0, %v3737_v4 }
  0x12   :  { %3293 = vmatmul.mubr.msk.bf16.gmra.mrb[4].mxu0 %vm269_vm0, %v3738_v5 }
  0x13   :  { %3296 = vmatprep.mubr.msk.bf16.mxu0 %vm269_vm0, %v3739_v6 }
  0x1a   :  { %3297 = vmatmul.mubr.msk.bf16.gmra.mrb[8].mxu0 %vm269_vm0, %v3740_v7 }
  0x1b   :  { %3300 = vmatprep.mubr.msk.bf16.mxu0 %vm269_vm0, %v3741_v8 }
  0x22   :  { %3301 = vmatmul.mubr.msk.bf16.gmra.mrb[12].mxu0 %vm269_vm0, %v3742_v9 }
  0x23   :  { %3304 = vmatprep.mubr.msk.bf16.mxu0 %vm269_vm0, %v3743_v10 }
  0x2a   :  { %3305 = vmatmul.mubr.msk.bf16.gmra.mrb[16].mxu0 %vm269_vm0, %v3744_v11 }
  0x2b   :  { %3308 = vmatprep.mubr.msk.bf16.mxu0 %vm269_vm0, %v3745_v12 }
  0x32   :  { %3309 = vmatmul.mubr.msk.bf16.gmra.mrb[20].mxu0 %vm269_vm0, %v3746_v13 }
  0x33   :  { %3312 = vmatprep.mubr.msk.bf16.mxu0 %vm269_vm0, %v3747_v14 }
  0x3a   :  { %3313 = vmatmul.mubr.msk.bf16.gmra.mrb[24].mxu0 %vm269_vm0, %v3748_v15 }
  0x3b   :  { %10 = vsyncpa [#allocation4], 0  ;;  %3316 = vmatprep.mubr.msk.bf16.mxu0 %vm269_vm0, %v3749_v16  ;;  %v3750_v17 = vld [vmem:[%s4709_s0 + $0x78] sm:$0xff]   ;;  %v3751_v18 = vld [vmem:[%s4709_s0 + $0x80] sm:$0xff]   ;;  %vm815_vm1 = vcmask 523264   ;;  %vm817_vm2 = vcmask 517120  }
  0x3c   :  { %v3752_v19 = vld [vmem:[%s4709_s0 + $0x88] sm:$0xff]   ;;  %v3753_v20 = vld [vmem:[%s4709_s0 + $0x90] sm:$0xff]   ;;  %v3754_v21 = vld [vmem:[%s4709_s0 + $0x98] sm:$0xff]   ;;  %v3827_v36 = vmov 0.0  }
  0x3d   :  { %v3755_v22 = vld [vmem:[%s4709_s0 + $0xa0] sm:$0xff]   ;;  %v3756_v23 = vld [vmem:[%s4709_s0 + $0xa8] sm:$0xff]   ;;  %v3757_v24 = vld [vmem:[%s4709_s0 + $0xb0] sm:$0xff]   ;;  %823 = vst.msk [vmem:[#allocation2 + $0x30] sm:$0xff] %vm815_vm1, %v3827_v36 }
  0x3e   :  { %v3758_v25 = vld [vmem:[%s4709_s0 + $0xb8] sm:$0xff]   ;;  %v3759_v26 = vld [vmem:[%s4709_s0 + $0xc0] sm:$0xff]   ;;  %v3760_v27 = vld [vmem:[%s4709_s0 + $0xc8] sm:$0xff]   ;;  %824 = vst.msk [vmem:[#allocation2 + $0x38] sm:$0x3] %vm817_vm2, %v3827_v36 }
  0x3f   :  { %v3761_v28 = vld [vmem:[%s4709_s0 + $0xd0] sm:$0xff]   ;;  %v3762_v29 = vld [vmem:[%s4709_s0 + $0xd8] sm:$0xff]   ;;  %v3763_v30 = vld [vmem:[%s4709_s0 + $0xe0] sm:$0xff]   ;;  %816 = vst.msk [vmem:[#allocation2] sm:$0xff] %vm815_vm1, %v3827_v36 }
  0x40   :  { %v3764_v31 = vld [vmem:[%s4709_s0 + $0xe8] sm:$0xff]   ;;  %v3765_v32 = vld [vmem:[%s4709_s0 + $0xf0] sm:$0xff]   ;;  %v3766_v33 = vld [vmem:[%s4709_s0 + $0xf8] sm:$0xff]   ;;  %818 = vst.msk [vmem:[#allocation2 + $0x8] sm:$0x3] %vm817_vm2, %v3827_v36 }
  0x41   :  { %v3767_v34 = vld [vmem:[%s4712_s3 + $0x20] sm:$0xff]   ;;  %819 = vst.msk [vmem:[#allocation2 + $0x10] sm:$0xff] %vm815_vm1, %v3827_v36  ;;  %821 = vst.msk [vmem:[#allocation2 + $0x20] sm:$0xff] %vm815_vm1, %v3827_v36  ;;  %v3769_v37 = vld [vmem:[%s4712_s3 + $0x28] sm:$0xff]  }
  0x42   :  { %3317 = vmatmul.mubr.msk.bf16.gmra.mrb[28].mxu0 %vm269_vm0, %v3750_v17  ;;  %v3768_v35 = vld [vmem:[%s4712_s3 + $0x40] sm:$0xff]   ;;  %3352 = vmatprep.subr.bf16.mxu0 %v3767_v34  ;;  %820 = vst.msk [vmem:[#allocation2 + $0x18] sm:$0x3] %vm817_vm2, %v3827_v36  ;;  %822 = vst.msk [vmem:[#allocation2 + $0x28] sm:$0x3] %vm817_vm2, %v3827_v36  ;;  %v3770_v38 = vld [vmem:[%s4712_s3 + $0x48] sm:$0xff]  }
  0x43   :  { %3320 = vmatprep.mubr.msk.bf16.mxu0 %vm269_vm0, %v3751_v18  ;;  %3400 = vmatprep.subr.bf16.mxu1 %v3768_v35  ;;  %825 = vst.msk [vmem:[#allocation2 + $0x40] sm:$0xff] %vm815_vm1, %v3827_v36  ;;  %827 = vst.msk [vmem:[#allocation2 + $0x50] sm:$0xff] %vm815_vm1, %v3827_v36  ;;  %v3771_v39 = vld [vmem:[%s4712_s3 + $0x30] sm:$0xff]   ;;  %v3773_v41 = vld [vmem:[%s4712_s3 + $0x38] sm:$0xff]  }
  0x44   :  { %3353 = vmatpush3.bf16.msra.mxu0 %v3767_v34  ;;  %3401 = vmatpush3.bf16.msra.mxu1 %v3768_v35  ;;  %826 = vst.msk [vmem:[#allocation2 + $0x48] sm:$0x3] %vm817_vm2, %v3827_v36  ;;  %828 = vst.msk [vmem:[#allocation2 + $0x58] sm:$0x3] %vm817_vm2, %v3827_v36  ;;  %v3772_v40 = vld [vmem:[%s4712_s3 + $0x50] sm:$0xff]   ;;  %v3774_v42 = vld [vmem:[%s4712_s3 + $0x58] sm:$0xff]  }
  0x45   :  { %829 = vst.msk [vmem:[#allocation2 + $0x60] sm:$0xff] %vm815_vm1, %v3827_v36  ;;  %831 = vst.msk [vmem:[#allocation2 + $0x70] sm:$0xff] %vm815_vm1, %v3827_v36  ;;  %3354 = vmatprep.subr.bf16.mxu0 %v3769_v37  ;;  %3402 = vmatprep.subr.bf16.mxu1 %v3770_v38  ;;  %v4062_v47 = vld [vmem:[%s4712_s3] sm:$0xff]  }
  0x46   :  { %830 = vst.msk [vmem:[#allocation2 + $0x68] sm:$0x3] %vm817_vm2, %v3827_v36  ;;  %832 = vst.msk [vmem:[#allocation2 + $0x78] sm:$0x3] %vm817_vm2, %v3827_v36  ;;  %v4067_v48 = vld [vmem:[%s4712_s3 + $0x60] sm:$0xff]  }
  0x47   :  { %833 = vst.msk [vmem:[#allocation2 + $0x80] sm:$0xff] %vm815_vm1, %v3827_v36  ;;  %835 = vst.msk [vmem:[#allocation2 + $0x90] sm:$0xff] %vm815_vm1, %v3827_v36  ;;  %v4074_v53 = vld [vmem:[%s4711_s2] ss:$0 sm:$0xff] }
  0x48   :  { %834 = vst.msk [vmem:[#allocation2 + $0x88] sm:$0x3] %vm817_vm2, %v3827_v36  ;;  %836 = vst.msk [vmem:[#allocation2 + $0x98] sm:$0x3] %vm817_vm2, %v3827_v36  ;;  %3355 = vmatpush3.bf16.msra.mxu0 %v3769_v37  ;;  %3403 = vmatpush3.bf16.msra.mxu1 %v3770_v38 }
  0x49   :  { %837 = vst.msk [vmem:[#allocation2 + $0xa0] sm:$0xff] %vm815_vm1, %v3827_v36  ;;  %839 = vst.msk [vmem:[#allocation2 + $0xb0] sm:$0xff] %vm815_vm1, %v3827_v36  ;;  %3356 = vmatprep.subr.bf16.mxu0 %v3771_v39  ;;  %3404 = vmatprep.subr.bf16.mxu1 %v3772_v40 }
  0x4a   :  { %3321 = vmatmul.mubr.msk.bf16.gmra.mrb[32].mxu0 %vm269_vm0, %v3752_v19  ;;  %838 = vst.msk [vmem:[#allocation2 + $0xa8] sm:$0x3] %vm817_vm2, %v3827_v36  ;;  %840 = vst.msk [vmem:[#allocation2 + $0xb8] sm:$0x3] %vm817_vm2, %v3827_v36 }
  0x4b   :  { %3324 = vmatprep.mubr.msk.bf16.mxu0 %vm269_vm0, %v3753_v20  ;;  %841 = vst.msk [vmem:[#allocation2 + $0xc0] sm:$0xff] %vm815_vm1, %v3827_v36  ;;  %843 = vst.msk [vmem:[#allocation2 + $0xd0] sm:$0xff] %vm815_vm1, %v3827_v36 }
  0x4c   :  { %842 = vst.msk [vmem:[#allocation2 + $0xc8] sm:$0x3] %vm817_vm2, %v3827_v36  ;;  %844 = vst.msk [vmem:[#allocation2 + $0xd8] sm:$0x3] %vm817_vm2, %v3827_v36  ;;  %3357 = vmatpush3.bf16.msra.mxu0 %v3771_v39  ;;  %3405 = vmatpush3.bf16.msra.mxu1 %v3772_v40 }
  0x4d   :  { %845 = vst.msk [vmem:[#allocation2 + $0xe0] sm:$0xff] %vm815_vm1, %v3827_v36  ;;  %847 = vst.msk [vmem:[#allocation2 + $0xf0] sm:$0xff] %vm815_vm1, %v3827_v36  ;;  %3358 = vmatprep.subr.bf16.mxu0 %v3773_v41  ;;  %3406 = vmatprep.subr.bf16.mxu1 %v3774_v42 }
  0x4e   :  { %846 = vst.msk [vmem:[#allocation2 + $0xe8] sm:$0x3] %vm817_vm2, %v3827_v36  ;;  %848 = vst.msk [vmem:[#allocation2 + $0xf8] sm:$0x3] %vm817_vm2, %v3827_v36 }
  0x4f   :  { %849 = vst.msk [vmem:[#allocation2 + $0x100] sm:$0xff] %vm815_vm1, %v3827_v36  ;;  %851 = vst.msk [vmem:[#allocation2 + $0x110] sm:$0xff] %vm815_vm1, %v3827_v36 }
  0x50   :  { %850 = vst.msk [vmem:[#allocation2 + $0x108] sm:$0x3] %vm817_vm2, %v3827_v36  ;;  %852 = vst.msk [vmem:[#allocation2 + $0x118] sm:$0x3] %vm817_vm2, %v3827_v36  ;;  %3359 = vmatpush3.bf16.msra.mxu0 %v3773_v41  ;;  %3407 = vmatpush3.bf16.msra.mxu1 %v3774_v42 }
  0x51   :  { %853 = vst.msk [vmem:[#allocation2 + $0x120] sm:$0xff] %vm815_vm1, %v3827_v36  ;;  %855 = vst.msk [vmem:[#allocation2 + $0x130] sm:$0xff] %vm815_vm1, %v3827_v36  ;;  %3376 = vmatprep.subr.bf16.mxu0 %v4062_v47  ;;  %3424 = vmatprep.subr.bf16.mxu1 %v4067_v48 }
  0x52   :  { %3325 = vmatmul.mubr.msk.bf16.gmra.mrb[36].mxu0 %vm269_vm0, %v3754_v21  ;;  %854 = vst.msk [vmem:[#allocation2 + $0x128] sm:$0x3] %vm817_vm2, %v3827_v36  ;;  %856 = vst.msk [vmem:[#allocation2 + $0x138] sm:$0x3] %vm817_vm2, %v3827_v36 }
  0x53   :  { %3328 = vmatprep.mubr.msk.bf16.mxu0 %vm269_vm0, %v3755_v22 }
  0x5a   :  { %3329 = vmatmul.mubr.msk.bf16.gmra.mrb[40].mxu0 %vm269_vm0, %v3756_v23 }
  0x5b   :  { %3332 = vmatprep.mubr.msk.bf16.mxu0 %vm269_vm0, %v3757_v24 }
  0x62   :  { %3333 = vmatmul.mubr.msk.bf16.gmra.mrb[44].mxu0 %vm269_vm0, %v3758_v25 }
  0x63   :  { %3336 = vmatprep.mubr.msk.bf16.mxu0 %vm269_vm0, %v3759_v26 }
  0x6a   :  { %3337 = vmatmul.mubr.msk.bf16.gmra.mrb[48].mxu0 %vm269_vm0, %v3760_v27 }
  0x6b   :  { %3340 = vmatprep.mubr.msk.bf16.mxu0 %vm269_vm0, %v3761_v28 }
  0x72   :  { %3341 = vmatmul.mubr.msk.bf16.gmra.mrb[52].mxu0 %vm269_vm0, %v3762_v29 }
  0x73   :  { %3344 = vmatprep.mubr.msk.bf16.mxu0 %vm269_vm0, %v3763_v30 }
  0x7a   :  { %3345 = vmatmul.mubr.msk.bf16.gmra.mrb[56].mxu0 %vm269_vm0, %v3764_v31 }
  0x7b   :  { %3348 = vmatprep.mubr.msk.bf16.mxu0 %vm269_vm0, %v3765_v32 }
  0x82   :  { %3349 = vmatmul.mubr.msk.bf16.gmra.mrb[60].mxu0 %vm269_vm0, %v3766_v33 }
  0xdd   :  { %v3290_v43 = vpop.f32.mrb[0].mxu0 }
  0xde   :  { %v400_v44 = vpop.f32.mrb[1].mxu0  ;;  %v409_v54 = vadd.f32 %v3290_v43, %v4074_v53 }
  0xdf   :  { %v3291_v45 = vpop.f32.mrb[2].mxu0  ;;  %v401_v55 = vadd.f32 %v4074_v53, %v400_v44 }
  0xe0   :  { %v403_v46 = vpop.f32.mrb[3].mxu0  ;;  %v412_v57 = vadd.f32 %v3291_v45, %v4074_v53  ;;  %v657_v63 = vmax.f32 %v409_v54, 0.0 }
  0xe1   :  { %v404_v60 = vadd.f32 %v4074_v53, %v403_v46  ;;  %v655_v3 = vmax.f32 %v401_v55, 0.0 }
  0xe2   :  { %v658_v6 = vmax.f32 %v412_v57, 0.0 }
  0xe3   :  { %v656_v10 = vmax.f32 %v404_v60, 0.0 }
  0xe5   :  { %v3294_v49 = vpop.f32.mrb[4].mxu0 }
  0xe6   :  { %v416_v50 = vpop.f32.mrb[5].mxu0  ;;  %v425_v14 = vadd.f32 %v3294_v49, %v4074_v53 }
  0xe7   :  { %v3295_v51 = vpop.f32.mrb[6].mxu0  ;;  %v417_v17 = vadd.f32 %v4074_v53, %v416_v50 }
  0xe8   :  { %v419_v52 = vpop.f32.mrb[7].mxu0  ;;  %v428_v21 = vadd.f32 %v3295_v51, %v4074_v53  ;;  %v661_v27 = vmax.f32 %v425_v14, 0.0 }
  0xe9   :  { %v420_v24 = vadd.f32 %v4074_v53, %v419_v52  ;;  %v659_v31 = vmax.f32 %v417_v17, 0.0 }
  0xea   :  { %v662_v34 = vmax.f32 %v428_v21, 0.0 }
  0xeb   :  { %v660_v38 = vmax.f32 %v420_v24, 0.0 }
  0xed   :  { %v3298_v56 = vpop.f32.mrb[8].mxu0 }
  0xee   :  { %v441_v58 = vadd.f32 %v3298_v56, %v4074_v53  ;;  %v432_v59 = vpop.f32.mrb[9].mxu0 }
  0xef   :  { %v433_v61 = vadd.f32 %v4074_v53, %v432_v59  ;;  %v3299_v62 = vpop.f32.mrb[10].mxu0 }
  0xf0   :  { %v665_v0 = vmax.f32 %v441_v58, 0.0  ;;  %v444_v1 = vadd.f32 %v3299_v62, %v4074_v53  ;;  %v435_v2 = vpop.f32.mrb[11].mxu0 }
  0xf1   :  { %v663_v4 = vmax.f32 %v433_v61, 0.0  ;;  %v436_v5 = vadd.f32 %v4074_v53, %v435_v2 }
  0xf2   :  { %v4084_v7 = vmax.f32 %v657_v63, %v665_v0  ;;  %v4086_v8 = vadd.f32 %v665_v0, %v657_v63  ;;  %v666_v9 = vmax.f32 %v444_v1, 0.0 }
  0xf3   :  { %v4088_v11 = vmax.f32 %v655_v3, %v663_v4  ;;  %v4090_v12 = vadd.f32 %v663_v4, %v655_v3  ;;  %v664_v13 = vmax.f32 %v436_v5, 0.0 }
  0xf4   :  { %v4093_v15 = vmax.f32 %v658_v6, %v666_v9  ;;  %v4095_v16 = vadd.f32 %v666_v9, %v658_v6 }
  0xf5   :  { %v4098_v18 = vmax.f32 %v656_v10, %v664_v13  ;;  %v4100_v19 = vadd.f32 %v664_v13, %v656_v10  ;;  %v3302_v20 = vpop.f32.mrb[12].mxu0 }
  0xf6   :  { %v457_v22 = vadd.f32 %v3302_v20, %v4074_v53  ;;  %v448_v23 = vpop.f32.mrb[13].mxu0 }
  0xf7   :  { %v449_v25 = vadd.f32 %v4074_v53, %v448_v23  ;;  %v3303_v26 = vpop.f32.mrb[14].mxu0 }
  0xf8   :  { %v669_v28 = vmax.f32 %v457_v22, 0.0  ;;  %v460_v29 = vadd.f32 %v3303_v26, %v4074_v53  ;;  %v451_v30 = vpop.f32.mrb[15].mxu0 }
  0xf9   :  { %v667_v32 = vmax.f32 %v449_v25, 0.0  ;;  %v452_v33 = vadd.f32 %v4074_v53, %v451_v30 }
  0xfa   :  { %v4108_v35 = vmax.f32 %v661_v27, %v669_v28  ;;  %v4110_v36 = vadd.f32 %v669_v28, %v661_v27  ;;  %v670_v37 = vmax.f32 %v460_v29, 0.0 }
  0xfb   :  { %v4112_v39 = vmax.f32 %v659_v31, %v667_v32  ;;  %v4114_v40 = vadd.f32 %v667_v32, %v659_v31  ;;  %v668_v41 = vmax.f32 %v452_v33, 0.0 }
  0xfc   :  { %v4116_v42 = vmax.f32 %v662_v34, %v670_v37  ;;  %v4118_v43 = vadd.f32 %v670_v37, %v662_v34 }
  0xfd   :  { %v4120_v44 = vmax.f32 %v660_v38, %v668_v41  ;;  %v4122_v45 = vadd.f32 %v668_v41, %v660_v38  ;;  %v3306_v46 = vpop.f32.mrb[16].mxu0 }
  0xfe   :  { %v464_v49 = vpop.f32.mrb[17].mxu0  ;;  %v473_v57 = vadd.f32 %v3306_v46, %v4074_v53 }
  0xff   :  { %v3307_v50 = vpop.f32.mrb[18].mxu0  ;;  %v465_v58 = vadd.f32 %v4074_v53, %v464_v49 }
 0x100   :  { %v467_v51 = vpop.f32.mrb[19].mxu0  ;;  %v476_v59 = vadd.f32 %v3307_v50, %v4074_v53  ;;  %v673_v2 = vmax.f32 %v473_v57, 0.0 }
 0x101   :  { %v468_v60 = vadd.f32 %v4074_v53, %v467_v51  ;;  %v671_v3 = vmax.f32 %v465_v58, 0.0 }
 0x102   :  { %v674_v9 = vmax.f32 %v476_v59, 0.0 }
 0x103   :  { %v672_v10 = vmax.f32 %v468_v60, 0.0 }
 0x105   :  { %v3310_v52 = vpop.f32.mrb[20].mxu0 }
 0x106   :  { %v480_v54 = vpop.f32.mrb[21].mxu0  ;;  %v489_v17 = vadd.f32 %v3310_v52, %v4074_v53 }
 0x107   :  { %v3311_v55 = vpop.f32.mrb[22].mxu0  ;;  %v481_v23 = vadd.f32 %v4074_v53, %v480_v54 }
 0x108   :  { %v483_v56 = vpop.f32.mrb[23].mxu0  ;;  %v492_v38 = vadd.f32 %v3311_v55, %v4074_v53  ;;  %v677_v52 = vmax.f32 %v489_v17, 0.0 }
 0x10a   :  { %v678_v59 = vmax.f32 %v492_v38, 0.0 }
 0x10d   :  { %v3314_v61 = vpop.f32.mrb[24].mxu0 }
 0x10e   :  { %v505_v62 = vadd.f32 %v3314_v61, %v4074_v53  ;;  %v496_v63 = vpop.f32.mrb[25].mxu0 }
 0x10f   :  { %v497_v0 = vadd.f32 %v4074_v53, %v496_v63  ;;  %v3315_v1 = vpop.f32.mrb[26].mxu0 }
 0x110   :  { %v681_v4 = vmax.f32 %v505_v62, 0.0  ;;  %v508_v5 = vadd.f32 %v3315_v1, %v4074_v53  ;;  %v499_v6 = vpop.f32.mrb[27].mxu0 }
 0x111   :  { %v679_v13 = vmax.f32 %v497_v0, 0.0  ;;  %v500_v14 = vadd.f32 %v4074_v53, %v499_v6  ;;  %v1229_v6 = vld [vmem:[#allocation2 + $0x2] sm:$0xff] }
 0x112   :  { %v737_v20 = vmax.f32 %v673_v2, %v681_v4  ;;  %v785_v21 = vadd.f32 %v681_v4, %v673_v2  ;;  %v682_v22 = vmax.f32 %v508_v5, 0.0  ;;  %v906_v5 = vld [vmem:[#allocation2 + $0x1] sm:$0xff] }
 0x113   :  { %v735_v24 = vmax.f32 %v671_v3, %v679_v13  ;;  %v783_v25 = vadd.f32 %v679_v13, %v671_v3  ;;  %v680_v26 = vmax.f32 %v500_v14, 0.0 }
 0x114   :  { %v753_v27 = vmax.f32 %v4084_v7, %v737_v20  ;;  %v738_v28 = vmax.f32 %v674_v9, %v682_v22  ;;  %v786_v29 = vadd.f32 %v682_v22, %v674_v9  ;;  %v801_v30 = vadd.f32 %v785_v21, %v4086_v8 }
 0x115   :  { %v751_v31 = vmax.f32 %v4088_v11, %v735_v24  ;;  %v736_v32 = vmax.f32 %v672_v10, %v680_v26  ;;  %v784_v33 = vadd.f32 %v680_v26, %v672_v10  ;;  %v3318_v34 = vpop.f32.mrb[28].mxu0  ;;  %v799_v37 = vadd.f32 %v783_v25, %v4090_v12 }
 0x116   :  { %860 = vst.msk [vmem:[#allocation2 + $0x31] sm:$0xff] %vm815_vm1, %v753_v27  ;;  %v754_v41 = vmax.f32 %v4093_v15, %v738_v28  ;;  %v521_v46 = vadd.f32 %v3318_v34, %v4074_v53  ;;  %v512_v7 = vpop.f32.mrb[29].mxu0  ;;  %v802_v49 = vadd.f32 %v786_v29, %v4095_v16  ;;  %v484_v8 = vadd.f32 %v4074_v53, %v483_v56 }
 0x117   :  { %858 = vst.msk [vmem:[#allocation2 + $0x11] sm:$0xff] %vm815_vm1, %v751_v31  ;;  %v752_v11 = vmax.f32 %v4098_v18, %v736_v32  ;;  %v513_v50 = vadd.f32 %v4074_v53, %v512_v7  ;;  %v3319_v12 = vpop.f32.mrb[30].mxu0  ;;  %v800_v51 = vadd.f32 %v784_v33, %v4100_v19  ;;  %v675_v16 = vmax.f32 %v481_v23, 0.0  ;;  %v3777_v33 = vld [vmem:[%s4712_s3 + $0x8] sm:$0xff]  }
 0x118   :  { %861 = vst.msk [vmem:[#allocation2 + $0x41] sm:$0xff] %vm815_vm1, %v754_v41  ;;  %v685_v15 = vmax.f32 %v521_v46, 0.0  ;;  %v524_v54 = vadd.f32 %v3319_v12, %v4074_v53  ;;  %v515_v55 = vpop.f32.mrb[31].mxu0  ;;  %v2628_v57 = vpack.c.bf16 %v802_v49, %v801_v30  ;;  %v676_v19 = vmax.f32 %v484_v8, 0.0 }
 0x119   :  { %859 = vst.msk [vmem:[#allocation2 + $0x21] sm:$0xff] %vm815_vm1, %v752_v11  ;;  %v683_v56 = vmax.f32 %v513_v50, 0.0  ;;  %v516_v58 = vadd.f32 %v4074_v53, %v515_v55  ;;  %v2627_v18 = vpack.c.bf16 %v800_v51, %v799_v37  ;;  %v3778_v37 = vld [vmem:[%s4712_s3 + $0x68] sm:$0xff]  }
 0x11a   :  { %v741_v60 = vmax.f32 %v677_v52, %v685_v15  ;;  %v789_v61 = vadd.f32 %v685_v15, %v677_v52  ;;  %v686_v62 = vmax.f32 %v524_v54, 0.0  ;;  %v3780_v15 = vld [vmem:[%s4712_s3 + $0x70] sm:$0xff]  }
 0x11b   :  { %v739_v63 = vmax.f32 %v675_v16, %v683_v56  ;;  %v787_v0 = vadd.f32 %v683_v56, %v675_v16  ;;  %v684_v1 = vmax.f32 %v516_v58, 0.0  ;;  %2643 = vxpose.xlu0.c.b16.start [1/4] (short) (narrow) %v2627_v18, 64  ;;  %v3781_v18 = vld [vmem:[%s4712_s3 + $0x18] sm:$0xff]  }
 0x11c   :  { %v757_v2 = vmax.f32 %v4108_v35, %v741_v60  ;;  %v742_v3 = vmax.f32 %v678_v59, %v686_v62  ;;  %v790_v4 = vadd.f32 %v686_v62, %v678_v59  ;;  %v805_v9 = vadd.f32 %v789_v61, %v4110_v36  ;;  %v3782_v60 = vld [vmem:[%s4712_s3 + $0x78] sm:$0xff]  }
 0x11d   :  { %v755_v10 = vmax.f32 %v4112_v39, %v739_v63  ;;  %v740_v13 = vmax.f32 %v676_v19, %v684_v1  ;;  %v788_v14 = vadd.f32 %v684_v1, %v676_v19  ;;  %v4155_v17 = vpop.f32.mrb[32].mxu0  ;;  %v803_v20 = vadd.f32 %v787_v0, %v4114_v40 }
 0x11e   :  { %864 = vst.msk [vmem:[#allocation2 + $0x71] sm:$0xff] %vm815_vm1, %v757_v2  ;;  %v758_v21 = vmax.f32 %v4116_v42, %v742_v3  ;;  %v4160_v22 = vpop.f32.mrb[33].mxu0  ;;  %v4162_v35 = vld [vmem:[#allocation2 + $0x11] sm:$0xff]  ;;  %v806_v36 = vadd.f32 %v790_v4, %v4118_v43  ;;  %v537_v62 = vadd.f32 %v4155_v17, %v4074_v53 }
 0x11f   :  { %v4164_v23 = vld [vmem:[#allocation2 + $0x12] sm:$0xff]  ;;  %862 = vst.msk [vmem:[#allocation2 + $0x51] sm:$0xff] %vm815_vm1, %v755_v10  ;;  %v756_v39 = vmax.f32 %v4120_v44, %v740_v13  ;;  %v4169_v24 = vpop.f32.mrb[34].mxu0  ;;  %2644 = vxpose.xlu0.c.b16.cont [2/4] (short) (narrow) %v2628_v57, 64  ;;  %v922_v40 = vpack.c.bf16 %v4162_v35, %v906_v5  ;;  %v804_v27 = vadd.f32 %v788_v14, %v4122_v45  ;;  %v4194_v31 = vld [vmem:[#allocation2 + $0x41] sm:$0xff] }
 0x120   :  { %v1245_v25 = vpack.c.bf16 %v4164_v23, %v1229_v6  ;;  %v4173_v42 = vld [vmem:[#allocation2 + $0x31] sm:$0xff]  ;;  %865 = vst.msk [vmem:[#allocation2 + $0x81] sm:$0xff] %vm815_vm1, %v758_v21  ;;  %v4176_v26 = vpop.f32.mrb[35].mxu0  ;;  %v4179_v43 = vld [vmem:[#allocation2 + $0x21] sm:$0xff]  ;;  %v2630_v29 = vpack.c.bf16 %v806_v36, %v805_v9  ;;  %v529_v19 = vadd.f32 %v4074_v53, %v4160_v22  ;;  %v540_v0 = vadd.f32 %v4169_v24, %v4074_v53 }
 0x121   :  { %v4181_v28 = vld [vmem:[#allocation2 + $0x22] sm:$0xff]  ;;  %v4183_v44 = vld [vmem:[#allocation2 + $0x32] sm:$0xff]  ;;  %863 = vst.msk [vmem:[#allocation2 + $0x61] sm:$0xff] %vm815_vm1, %v756_v39  ;;  %3360 = vmatprep.mubr.msk.bf16.mxu0 %vm815_vm1, %v922_v40  ;;  %v4190_v30 = vpack.c.bf16 %v4173_v42, %v4179_v43  ;;  %v2629_v34 = vpack.c.bf16 %v804_v27, %v803_v20  ;;  %v532_v3 = vadd.f32 %v4074_v53, %v4176_v26  ;;  %v689_v9 = vmax.f32 %v537_v62, 0.0 }
 0x122   :  { %3408 = vmatprep.mubr.msk.bf16.mxu1 %vm815_vm1, %v1245_v25  ;;  %v1246_v45 = vpack.c.bf16 %v4183_v44, %v4181_v28  ;;  %v4196_v32 = vld [vmem:[#allocation2 + $0x42] sm:$0xff]  ;;  %v687_v17 = vmax.f32 %v529_v19, 0.0  ;;  %v690_v22 = vmax.f32 %v540_v0, 0.0 }
 0x123   :  { %3361 = vmatmul.mubr.msk.bf16.vlgmr.msra.gmra.mrb[64].mxu0 %vm815_vm1, %v4190_v30  ;;  %2645 = vxpose.xlu0.c.b16.cont [3/4] (short) (narrow) %v2629_v34, 64  ;;  %v4285_v6 = vld [vmem:[%s4712_s3 + $0x80] sm:$0xff]   ;;  %v688_v40 = vmax.f32 %v532_v3, 0.0 }
 0x124   :  { %3409 = vmatmul.mubr.msk.bf16.vlgmr.msra.gmra.mrb[0].mxu1 %vm815_vm1, %v1246_v45  ;;  %3377 = vmatpush3.bf16.msra.mxu0 %v4062_v47  ;;  %v3779_v47 = vld [vmem:[%s4712_s3 + $0x10] sm:$0xff]  }
 0x125   :  { %v4216_v49 = vpop.f32.mrb[36].mxu0  ;;  %3425 = vmatpush3.bf16.msra.mxu1 %v4067_v48  ;;  %3378 = vmatprep.subr.bf16.mxu0 %v3777_v33  ;;  %v4236_v52 = vld [vmem:[#allocation2 + $0x71] sm:$0xff] }
 0x126   :  { %v4219_v8 = vpop.f32.mrb[37].mxu0  ;;  %v4221_v11 = vld [vmem:[#allocation2 + $0x51] sm:$0xff]  ;;  %3426 = vmatprep.subr.bf16.mxu1 %v3778_v37 }
 0x127   :  { %v4223_v50 = vld [vmem:[#allocation2 + $0x52] sm:$0xff]  ;;  %v4228_v12 = vpop.f32.mrb[38].mxu0  ;;  %v4232_v51 = vpack.c.bf16 %v4221_v11, %v4194_v31  ;;  %2646 = vxpose.xlu0.c.b16.end [4/4] (short) (narrow) %v2630_v29, 64  ;;  %v553_v29 = vadd.f32 %v4216_v49, %v4074_v53  ;;  %v545_v34 = vadd.f32 %v4074_v53, %v4219_v8 }
 0x128   :  { %v1247_v48 = vpack.c.bf16 %v4223_v50, %v4196_v32  ;;  %v547_v54 = vpop.f32.mrb[39].mxu0  ;;  %v4241_v55 = vld [vmem:[#allocation2 + $0x61] sm:$0xff]  ;;  %v4245_v16 = vld [vmem:[#allocation2 + $0x72] sm:$0xff]  ;;  %3379 = vmatpush3.bf16.msra.mxu0 %v3777_v33 }
 0x129   :  { %v4243_v57 = vld [vmem:[#allocation2 + $0x62] sm:$0xff]  ;;  %3364 = vmatprep.mubr.msk.bf16.mxu0 %vm815_vm1, %v4232_v51  ;;  %v4252_v56 = vpack.c.bf16 %v4236_v52, %v4241_v55  ;;  %3427 = vmatpush3.bf16.msra.mxu1 %v3778_v37  ;;  %v548_v49 = vadd.f32 %v4074_v53, %v547_v54 }
 0x12a   :  { %3412 = vmatprep.mubr.msk.bf16.mxu1 %vm815_vm1, %v1247_v48  ;;  %v4256_v58 = vpack.c.bf16 %v4245_v16, %v4243_v57  ;;  %3380 = vmatprep.subr.bf16.mxu0 %v3779_v47 }
 0x12b   :  { %3365 = vmatmul.mubr.msk.bf16.gmra.mrb[68].mxu0 %vm815_vm1, %v4252_v56  ;;  %3428 = vmatprep.subr.bf16.mxu1 %v3780_v15 }
 0x12c   :  { %3413 = vmatmul.mubr.msk.bf16.gmra.mrb[4].mxu1 %vm815_vm1, %v4256_v58  ;;  %3381 = vmatpush3.bf16.msra.mxu0 %v3779_v47 }
 0x12d   :  { %v3330_v63 = vpop.f32.mrb[40].mxu0  ;;  %3382 = vmatprep.subr.bf16.mxu0 %v3781_v18  ;;  %3429 = vmatpush3.bf16.msra.mxu1 %v3780_v15  ;;  %v556_v15 = vadd.f32 %v4228_v12, %v4074_v53 }
 0x12e   :  { %v569_v1 = vadd.f32 %v3330_v63, %v4074_v53  ;;  %v560_v2 = vpop.f32.mrb[41].mxu0  ;;  %3430 = vmatprep.subr.bf16.mxu1 %v3782_v60  ;;  %v693_v63 = vmax.f32 %v553_v29, 0.0 }
 0x12f   :  { %v561_v4 = vadd.f32 %v4074_v53, %v560_v2  ;;  %v3331_v5 = vpop.f32.mrb[42].mxu0  ;;  %v691_v2 = vmax.f32 %v545_v34, 0.0 }
 0x130   :  { %v697_v10 = vmax.f32 %v569_v1, 0.0  ;;  %v572_v13 = vadd.f32 %v3331_v5, %v4074_v53  ;;  %v563_v14 = vpop.f32.mrb[43].mxu0  ;;  %3383 = vmatpush3.bf16.msra.mxu0 %v3781_v18  ;;  %v694_v5 = vmax.f32 %v556_v15, 0.0 }
 0x131   :  { %v695_v20 = vmax.f32 %v561_v4, 0.0  ;;  %v564_v21 = vadd.f32 %v4074_v53, %v563_v14  ;;  %3431 = vmatpush3.bf16.msra.mxu1 %v3782_v60 }
 0x132   :  { %v4289_v36 = vmax.f32 %v689_v9, %v697_v10  ;;  %v4291_v39 = vadd.f32 %v697_v10, %v689_v9  ;;  %v698_v24 = vmax.f32 %v572_v13, 0.0  ;;  %3448 = vmatprep.subr.bf16.mxu1 %v4285_v6  ;;  %v692_v13 = vmax.f32 %v548_v49, 0.0 }
 0x133   :  { %v4293_v25 = vmax.f32 %v687_v17, %v695_v20  ;;  %v4295_v26 = vadd.f32 %v695_v20, %v687_v17  ;;  %v696_v27 = vmax.f32 %v564_v21, 0.0 }
 0x134   :  { %v4300_v45 = vmax.f32 %v690_v22, %v698_v24  ;;  %v4302_v33 = vadd.f32 %v698_v24, %v690_v22 }
 0x135   :  { %v4306_v37 = vmax.f32 %v688_v40, %v696_v27  ;;  %v4308_v47 = vadd.f32 %v696_v27, %v688_v40  ;;  %v3334_v48 = vpop.f32.mrb[44].mxu0 }
 0x136   :  { %v585_v18 = vadd.f32 %v3334_v48, %v4074_v53  ;;  %v576_v60 = vpop.f32.mrb[45].mxu0 }
 0x137   :  { %v577_v62 = vadd.f32 %v4074_v53, %v576_v60  ;;  %v3335_v19 = vpop.f32.mrb[46].mxu0 }
 0x138   :  { %v701_v0 = vmax.f32 %v585_v18, 0.0  ;;  %v588_v8 = vadd.f32 %v3335_v19, %v4074_v53  ;;  %v579_v1 = vpop.f32.mrb[47].mxu0 }
 0x139   :  { %v699_v3 = vmax.f32 %v577_v62, 0.0  ;;  %v580_v4 = vadd.f32 %v4074_v53, %v579_v1 }
 0x13a   :  { %v4317_v9 = vmax.f32 %v693_v63, %v701_v0  ;;  %v4319_v12 = vadd.f32 %v701_v0, %v693_v63  ;;  %v702_v10 = vmax.f32 %v588_v8, 0.0 }
 0x13b   :  { %v4321_v54 = vmax.f32 %v691_v2, %v699_v3  ;;  %v4323_v14 = vadd.f32 %v699_v3, %v691_v2  ;;  %v700_v17 = vmax.f32 %v580_v4, 0.0 }
 0x13c   :  { %v4325_v20 = vmax.f32 %v694_v5, %v702_v10  ;;  %v4327_v21 = vadd.f32 %v702_v10, %v694_v5 }
 0x13d   :  { %v4329_v22 = vmax.f32 %v692_v13, %v700_v17  ;;  %v4331_v24 = vadd.f32 %v700_v17, %v692_v13  ;;  %v3338_v40 = vpop.f32.mrb[48].mxu0 }
 0x13e   :  { %v592_v27 = vpop.f32.mrb[49].mxu0  ;;  %v601_v49 = vadd.f32 %v3338_v40, %v4074_v53 }
 0x13f   :  { %v3339_v29 = vpop.f32.mrb[50].mxu0  ;;  %v593_v62 = vadd.f32 %v4074_v53, %v592_v27 }
 0x140   :  { %v595_v34 = vpop.f32.mrb[51].mxu0  ;;  %v604_v19 = vadd.f32 %v3339_v29, %v4074_v53  ;;  %v705_v4 = vmax.f32 %v601_v49, 0.0 }
 0x141   :  { %v596_v63 = vadd.f32 %v4074_v53, %v595_v34  ;;  %v703_v5 = vmax.f32 %v593_v62, 0.0 }
 0x142   :  { %v706_v40 = vmax.f32 %v604_v19, 0.0 }
 0x143   :  { %v704_v61 = vmax.f32 %v596_v63, 0.0 }
 0x145   :  { %v3342_v48 = vpop.f32.mrb[52].mxu0 }
 0x146   :  { %v608_v15 = vpop.f32.mrb[53].mxu0  ;;  %v617_v34 = vadd.f32 %v3342_v48, %v4074_v53 }
 0x147   :  { %v3343_v18 = vpop.f32.mrb[54].mxu0  ;;  %v609_v59 = vadd.f32 %v4074_v53, %v608_v15 }
 0x148   :  { %v611_v60 = vpop.f32.mrb[55].mxu0 }
 0x14d   :  { %v3346_v0 = vpop.f32.mrb[56].mxu0 }
 0x14e   :  { %v633_v8 = vadd.f32 %v3346_v0, %v4074_v53  ;;  %v624_v1 = vpop.f32.mrb[57].mxu0 }
 0x14f   :  { %v625_v2 = vadd.f32 %v4074_v53, %v624_v1  ;;  %v3347_v3 = vpop.f32.mrb[58].mxu0 }
 0x150   :  { %v713_v10 = vmax.f32 %v633_v8, 0.0  ;;  %v636_v13 = vadd.f32 %v3347_v3, %v4074_v53  ;;  %v627_v17 = vpop.f32.mrb[59].mxu0 }
 0x151   :  { %v711_v27 = vmax.f32 %v625_v2, 0.0  ;;  %v628_v29 = vadd.f32 %v4074_v53, %v627_v17 }
 0x152   :  { %v745_v7 = vmax.f32 %v705_v4, %v713_v10  ;;  %v793_v46 = vadd.f32 %v713_v10, %v705_v4  ;;  %v714_v0 = vmax.f32 %v636_v13, 0.0  ;;  %v620_v4 = vadd.f32 %v3343_v18, %v4074_v53 }
 0x153   :  { %v743_v1 = vmax.f32 %v703_v5, %v711_v27  ;;  %v791_v41 = vadd.f32 %v711_v27, %v703_v5  ;;  %v712_v49 = vmax.f32 %v628_v29, 0.0 }
 0x154   :  { %v761_v62 = vmax.f32 %v4289_v36, %v745_v7  ;;  %v746_v8 = vmax.f32 %v706_v40, %v714_v0  ;;  %v794_v3 = vadd.f32 %v714_v0, %v706_v40  ;;  %v809_v19 = vadd.f32 %v793_v46, %v4291_v39 }
 0x155   :  { %v759_v63 = vmax.f32 %v4293_v25, %v743_v1  ;;  %v744_v2 = vmax.f32 %v704_v61, %v712_v49  ;;  %v792_v17 = vadd.f32 %v712_v49, %v704_v61  ;;  %v3350_v38 = vpop.f32.mrb[60].mxu0  ;;  %v807_v48 = vadd.f32 %v791_v41, %v4295_v26 }
 0x156   :  { %868 = vst.msk [vmem:[#allocation2 + $0xd1] sm:$0xff] %vm815_vm1, %v761_v62  ;;  %v762_v15 = vmax.f32 %v4300_v45, %v746_v8  ;;  %v649_v5 = vadd.f32 %v3350_v38, %v4074_v53  ;;  %v640_v7 = vpop.f32.mrb[61].mxu0  ;;  %v810_v36 = vadd.f32 %v794_v3, %v4302_v33  ;;  %v612_v46 = vadd.f32 %v4074_v53, %v611_v60 }
 0x157   :  { %866 = vst.msk [vmem:[#allocation2 + $0xb1] sm:$0xff] %vm815_vm1, %v759_v63  ;;  %v760_v61 = vmax.f32 %v4306_v37, %v744_v2  ;;  %v641_v39 = vadd.f32 %v4074_v53, %v640_v7  ;;  %v3351_v41 = vpop.f32.mrb[62].mxu0  ;;  %v808_v25 = vadd.f32 %v792_v17, %v4308_v47  ;;  %v709_v26 = vmax.f32 %v617_v34, 0.0 }
 0x158   :  { %869 = vst.msk [vmem:[#allocation2 + $0xe1] sm:$0xff] %vm815_vm1, %v762_v15  ;;  %v717_v45 = vmax.f32 %v649_v5, 0.0  ;;  %v652_v38 = vadd.f32 %v3351_v41, %v4074_v53  ;;  %v643_v18 = vpop.f32.mrb[63].mxu0  ;;  %v2632_v10 = vpack.c.bf16 %v810_v36, %v809_v19  ;;  %v707_v33 = vmax.f32 %v609_v59, 0.0  ;;  %v914_v59 = vld [vmem:[#allocation2 + $0xa1] sm:$0xff] }
 0x159   :  { %867 = vst.msk [vmem:[#allocation2 + $0xc1] sm:$0xff] %vm815_vm1, %v760_v61  ;;  %v715_v60 = vmax.f32 %v641_v39, 0.0  ;;  %v644_v13 = vadd.f32 %v4074_v53, %v643_v18  ;;  %v2631_v37 = vpack.c.bf16 %v808_v25, %v807_v48  ;;  %v710_v40 = vmax.f32 %v620_v4, 0.0  ;;  %v1237_v19 = vld [vmem:[#allocation2 + $0xa2] sm:$0xff] }
 0x15a   :  { %v749_v27 = vmax.f32 %v709_v26, %v717_v45  ;;  %v797_v29 = vadd.f32 %v717_v45, %v709_v26  ;;  %v718_v0 = vmax.f32 %v652_v38, 0.0  ;;  %v708_v47 = vmax.f32 %v612_v46, 0.0  ;;  %v874_v45 = vld [vmem:[#allocation2] sm:$0xff] }
 0x15b   :  { %v747_v34 = vmax.f32 %v707_v33, %v715_v60  ;;  %v795_v1 = vadd.f32 %v715_v60, %v707_v33  ;;  %v716_v49 = vmax.f32 %v644_v13, 0.0  ;;  %2752 = vxpose.xlu1.c.b16.start [1/4] (short) (narrow) %v2631_v37, 64  ;;  %v875_v37 = vld [vmem:[#allocation2 + $0x10] sm:$0xff] }
 0x15c   :  { %v765_v62 = vmax.f32 %v4317_v9, %v749_v27  ;;  %v750_v8 = vmax.f32 %v710_v40, %v718_v0  ;;  %v798_v3 = vadd.f32 %v718_v0, %v710_v40  ;;  %v813_v63 = vadd.f32 %v797_v29, %v4319_v12  ;;  %v1424_v40 = vld [vmem:[#allocation2 + $0x20] sm:$0xff] }
 0x15d   :  { %v763_v53 = vmax.f32 %v4321_v54, %v747_v34  ;;  %v748_v2 = vmax.f32 %v708_v47, %v716_v49  ;;  %v796_v17 = vadd.f32 %v716_v49, %v708_v47  ;;  %v811_v48 = vadd.f32 %v795_v1, %v4323_v14  ;;  %v4377_v36 = vld [vmem:[#allocation2 + $0xd1] sm:$0xff] }
 0x15e   :  { %872 = vst.msk [vmem:[#allocation2 + $0x111] sm:$0xff] %vm815_vm1, %v765_v62  ;;  %v766_v4 = vmax.f32 %v4325_v20, %v750_v8  ;;  %v4367_v15 = vld [vmem:[#allocation2 + $0xb1] sm:$0xff]  ;;  %v814_v9 = vadd.f32 %v798_v3, %v4327_v21  ;;  %v890_v1 = vpack.c.bf16 %v875_v37, %v874_v45  ;;  %v1439_v62 = vpack.c.bf16 %v1424_v40, %v875_v37  ;;  %v1426_v8 = vld [vmem:[#allocation2 + $0x40] sm:$0xff] }
 0x15f   :  { %v4369_v5 = vld [vmem:[#allocation2 + $0xb2] sm:$0xff]  ;;  %870 = vst.msk [vmem:[#allocation2 + $0xf1] sm:$0xff] %vm815_vm1, %v763_v53  ;;  %v764_v12 = vmax.f32 %v4329_v22, %v748_v2  ;;  %2753 = vxpose.xlu1.c.b16.cont [2/4] (short) (narrow) %v2632_v10, 64  ;;  %v926_v54 = vpack.c.bf16 %v4367_v15, %v914_v59  ;;  %v812_v14 = vadd.f32 %v796_v17, %v4331_v24  ;;  %v4386_v39 = vld [vmem:[#allocation2 + $0xe2] sm:$0xff] }
 0x160   :  { %v1249_v7 = vpack.c.bf16 %v4369_v5, %v1237_v19  ;;  %v4379_v20 = vld [vmem:[#allocation2 + $0xd2] sm:$0xff]  ;;  %873 = vst.msk [vmem:[#allocation2 + $0x121] sm:$0xff] %vm815_vm1, %v766_v4  ;;  %v4382_v46 = vld [vmem:[#allocation2 + $0xc1] sm:$0xff]  ;;  %v2634_v61 = vpack.c.bf16 %v814_v9, %v813_v63 }
 0x161   :  { %v4384_v21 = vld [vmem:[#allocation2 + $0xc2] sm:$0xff]  ;;  %871 = vst.msk [vmem:[#allocation2 + $0x101] sm:$0xff] %vm815_vm1, %v764_v12  ;;  %3368 = vmatprep.mubr.msk.bf16.mxu0 %vm815_vm1, %v926_v54  ;;  %v2633_v22 = vpack.c.bf16 %v812_v14, %v811_v48  ;;  %v4393_v24 = vpack.c.bf16 %v4377_v36, %v4382_v46  ;;  %v1832_v26 = vpack.c.bf16 %v4386_v39, %v4379_v20  ;;  %v879_v3 = vld [vmem:[#allocation2 + $0x50] sm:$0xff] }
 0x162   :  { %3416 = vmatprep.mubr.msk.bf16.mxu1 %vm815_vm1, %v1249_v7  ;;  %v4397_v41 = vpack.c.bf16 %v4379_v20, %v4384_v21  ;;  %v1831_v25 = vpack.c.bf16 %v4384_v21, %v4369_v5  ;;  %v4407_v38 = vld [vmem:[#allocation2 + $0xe1] sm:$0xff]  ;;  %v877_v59 = vld [vmem:[#allocation2 + $0x30] sm:$0xff]  ;;  %v4451_v2 = vpack.c.bf16 %v879_v3, %v1426_v8 }
 0x163   :  { %2754 = vxpose.xlu1.c.b16.cont [3/4] (short) (narrow) %v2633_v22, 64  ;;  %3369 = vmatmul.mubr.msk.bf16.gmra.mrb[72].mxu0 %vm815_vm1, %v4393_v24  ;;  %v1428_v19 = vld [vmem:[#allocation2 + $0x60] sm:$0xff]  ;;  %v4449_v63 = vpack.c.bf16 %v877_v59, %v1424_v40  ;;  %v1440_v53 = vpack.c.bf16 %v1426_v8, %v877_v59  ;;  %v3784_v17 = vld [vmem:[%s4712_s3 + $0x88] sm:$0xff]   ;;  %v3785_v4 = vld [vmem:[%s4712_s3 + $0x90] sm:$0xff]  }
 0x164   :  { %3417 = vmatmul.mubr.msk.bf16.gmra.mrb[8].mxu1 %vm815_vm1, %v4397_v41  ;;  %v1441_v48 = vpack.c.bf16 %v1428_v19, %v879_v3  ;;  %v4466_v9 = vld [vmem:[#allocation2 + $0x80] sm:$0xff]  ;;  %v883_v54 = vld [vmem:[#allocation2 + $0xb0] sm:$0xff] }
 0x165   :  { %v4421_v13 = vld [vmem:[#allocation2 + $0x111] sm:$0xff]  ;;  %v882_v12 = vld [vmem:[#allocation2 + $0xa0] sm:$0xff] }
 0x166   :  { %v4409_v18 = vld [vmem:[#allocation2 + $0xf1] sm:$0xff]  ;;  %v1432_v14 = vld [vmem:[#allocation2 + $0xc0] sm:$0xff]  ;;  %v894_v45 = vpack.c.bf16 %v883_v54, %v882_v12 }
 0x167   :  { %v4411_v10 = vld [vmem:[#allocation2 + $0xf2] sm:$0xff]  ;;  %2755 = vxpose.xlu1.c.b16.end [4/4] (short) (narrow) %v2634_v61, 64  ;;  %v4415_v33 = vpack.c.bf16 %v4409_v18, %v4407_v38  ;;  %v1443_v37 = vpack.c.bf16 %v1432_v14, %v883_v54  ;;  %v3787_v40 = vld [vmem:[%s4712_s3 + $0xa0] sm:$0xff]  }
 0x168   :  { %v4419_v60 = vpack.c.bf16 %v4411_v10, %v4386_v39  ;;  %v4423_v27 = vld [vmem:[#allocation2 + $0x101] sm:$0xff]  ;;  %v4427_v0 = vld [vmem:[#allocation2 + $0x112] sm:$0xff] }
 0x169   :  { %v4425_v29 = vld [vmem:[#allocation2 + $0x102] sm:$0xff]  ;;  %3372 = vmatprep.mubr.msk.bf16.mxu0 %vm815_vm1, %v4415_v33  ;;  %v4435_v47 = vpack.c.bf16 %v4421_v13, %v4423_v27  ;;  %v881_v7 = vld [vmem:[#allocation2 + $0x70] sm:$0xff]  ;;  %v3798_v39 = vld [vmem:[%s4712_s3 + $0xf8] sm:$0xff]  }
 0x16a   :  { %3420 = vmatprep.mubr.msk.bf16.mxu1 %vm815_vm1, %v4419_v60  ;;  %v4439_v34 = vpack.c.bf16 %v4427_v0, %v4425_v29  ;;  %v1833_v49 = vpack.c.bf16 %v4425_v29, %v4411_v10  ;;  %v4468_v61 = vpack.c.bf16 %v881_v7, %v1428_v19  ;;  %v1442_v22 = vpack.c.bf16 %v4466_v9, %v881_v7  ;;  %v885_v8 = vld [vmem:[#allocation2 + $0xd0] sm:$0xff]  ;;  %v1436_v3 = vld [vmem:[#allocation2 + $0x100] sm:$0xff] }
 0x16b   :  { %3373 = vmatmul.mubr.msk.bf16.gmra.mrb[76].mxu0 %vm815_vm1, %v4435_v47  ;;  %v4482_v59 = vpack.c.bf16 %v885_v8, %v1432_v14  ;;  %v4715_v7 = vpack.c.bf16 %v4179_v43, %v4162_v35  ;;  %v3788_v14 = vld [vmem:[%s4712_s3 + $0xa8] sm:$0xff]   ;;  %v3789_v35 = vld [vmem:[%s4712_s3 + $0xb0] sm:$0xff]  }
 0x16c   :  { %3421 = vmatmul.mubr.msk.bf16.gmra.mrb[12].mxu1 %vm815_vm1, %v4439_v34  ;;  %3384 = vmatprep.mubr.msk.bf16.mxu0 %vm815_vm1, %v890_v1  ;;  %v1434_v1 = vld [vmem:[#allocation2 + $0xe0] sm:$0xff]  ;;  %v3797_v5 = vld [vmem:[%s4712_s3 + $0xf0] sm:$0xff]  }
 0x16d   :  { %3432 = vmatprep.mubr.msk.bf16.mxu1 %vm815_vm1, %v1439_v62  ;;  %v887_v62 = vld [vmem:[#allocation2 + $0xf0] sm:$0xff]  ;;  %v1444_v19 = vpack.c.bf16 %v1434_v1, %v885_v8  ;;  %v4518_v43 = vld [vmem:[#allocation2 + $0x81] sm:$0xff] }
 0x16e   :  { %v2013_v20 = vld [vmem:[#allocation2 + $0x90] sm:$0xff] }
 0x16f   :  { %v2025_v21 = vpack.c.bf16 %v2013_v20, %v4466_v9  ;;  %v3801_v29 = vld [vmem:[%s4712_s3 + $0x110] sm:$0xff]  }
 0x173   :  { %3385 = vmatmul.mubr.msk.bf16.vlgmr.msra.gmra.mrb[64].mxu0 %vm815_vm1, %v4449_v63 }
 0x174   :  { %3433 = vmatmul.mubr.msk.bf16.vlgmr.msra.gmra.mrb[0].mxu1 %vm815_vm1, %v1440_v53  ;;  %3388 = vmatprep.mubr.msk.bf16.mxu0 %vm815_vm1, %v4451_v2  ;;  %v4484_v53 = vpack.c.bf16 %v887_v62, %v1434_v1  ;;  %v2409_v1 = vld [vmem:[#allocation2 + $0x132] sm:$0xff] }
 0x175   :  { %3436 = vmatprep.mubr.msk.bf16.mxu1 %vm815_vm1, %v1441_v48  ;;  %3449 = vmatpush3.bf16.msra.mxu1 %v4285_v6  ;;  %v3786_v6 = vld [vmem:[%s4712_s3 + $0x98] sm:$0xff]   ;;  %v4492_v48 = vld [vmem:[#allocation2 + $0x120] sm:$0xff] }
 0x176   :  { %3450 = vmatprep.subr.bf16.mxu1 %v3784_v17 }
 0x179   :  { %3451 = vmatpush3.bf16.msra.mxu1 %v3784_v17  ;;  %v1445_v17 = vpack.c.bf16 %v1436_v3, %v887_v62 }
 0x17a   :  { %3452 = vmatprep.subr.bf16.mxu1 %v3785_v4 }
 0x17b   :  { %3389 = vmatmul.mubr.msk.bf16.gmra.mrb[68].mxu0 %vm815_vm1, %v4468_v61 }
 0x17c   :  { %3437 = vmatmul.mubr.msk.bf16.gmra.mrb[4].mxu1 %vm815_vm1, %v1442_v22  ;;  %3392 = vmatprep.mubr.msk.bf16.mxu0 %vm815_vm1, %v894_v45  ;;  %v4716_v22 = vpack.c.bf16 %v4194_v31, %v4173_v42  ;;  %v4717_v45 = vpack.c.bf16 %v4241_v55, %v4221_v11  ;;  %v3790_v42 = vld [vmem:[%s4712_s3 + $0xb8] sm:$0xff]   ;;  %v1637_v31 = vpack.c.bf16 %v4382_v46, %v4367_v15  ;;  %v3791_v11 = vld [vmem:[%s4712_s3 + $0xc0] sm:$0xff]  }
 0x17d   :  { %3440 = vmatprep.mubr.msk.bf16.mxu1 %vm815_vm1, %v1443_v37  ;;  %3453 = vmatpush3.bf16.msra.mxu1 %v3785_v4  ;;  %v889_v4 = vld [vmem:[#allocation2 + $0x110] sm:$0xff]  ;;  %v1639_v55 = vpack.c.bf16 %v4423_v27, %v4409_v18  ;;  %v4538_v15 = vld [vmem:[#allocation2 + $0x121] sm:$0xff]  ;;  %v4718_v37 = vpack.c.bf16 %v4181_v28, %v4164_v23  ;;  %v4720_v18 = vpack.c.bf16 %v4243_v57, %v4223_v50 }
 0x17e   :  { %3454 = vmatprep.subr.bf16.mxu1 %v3786_v6  ;;  %v4494_v12 = vpack.c.bf16 %v889_v4, %v1436_v3  ;;  %v1446_v54 = vpack.c.bf16 %v4492_v48, %v889_v4  ;;  %v1640_v46 = vpack.c.bf16 %v4538_v15, %v4421_v13  ;;  %v3793_v23 = vld [vmem:[%s4712_s3 + $0xd0] sm:$0xff]   ;;  %v4561_v28 = vld [vmem:[#allocation2 + $0x82] sm:$0xff] }
 0x17f   :  { %v1830_v13 = vpack.c.bf16 %v4561_v28, %v4245_v16  ;;  %v4584_v50 = vld [vmem:[#allocation2 + $0x122] sm:$0xff] }
 0x180   :  { %v1834_v57 = vpack.c.bf16 %v4584_v50, %v4427_v0  ;;  %v3796_v16 = vld [vmem:[%s4712_s3 + $0xe8] sm:$0xff]   ;;  %v2207_v0 = vld [vmem:[#allocation2 + $0x91] sm:$0xff]  ;;  %v2417_v62 = vpack.c.bf16 %v2409_v1, %v4584_v50 }
 0x181   :  { %3455 = vmatpush3.bf16.msra.mxu1 %v3786_v6  ;;  %v1636_v6 = vpack.c.bf16 %v4518_v43, %v4236_v52  ;;  %v1638_v52 = vpack.c.bf16 %v4407_v38, %v4377_v36  ;;  %v3792_v36 = vld [vmem:[%s4712_s3 + $0xc8] sm:$0xff]   ;;  %v4719_v38 = vpack.c.bf16 %v4196_v32, %v4183_v44  ;;  %v3794_v44 = vld [vmem:[%s4712_s3 + $0xd8] sm:$0xff]   ;;  %v3795_v32 = vld [vmem:[%s4712_s3 + $0xe0] sm:$0xff]  }
 0x182   :  { %3472 = vmatprep.subr.bf16.mxu1 %v3787_v40  ;;  %v3800_v27 = vld [vmem:[%s4712_s3 + $0x108] sm:$0xff]  }
 0x183   :  { %3393 = vmatmul.mubr.msk.bf16.gmra.mrb[72].mxu0 %vm815_vm1, %v4482_v59 }
 0x184   :  { %3441 = vmatmul.mubr.msk.bf16.gmra.mrb[8].mxu1 %vm815_vm1, %v1444_v19  ;;  %3396 = vmatprep.mubr.msk.bf16.mxu0 %vm815_vm1, %v4484_v53 }
 0x185   :  { %3444 = vmatprep.mubr.msk.bf16.mxu1 %vm815_vm1, %v1445_v17 }
 0x18b   :  { %3397 = vmatmul.mubr.msk.bf16.gmra.mrb[76].mxu0 %vm815_vm1, %v4494_v12 }
 0x18c   :  { %3445 = vmatmul.mubr.msk.bf16.gmra.mrb[12].mxu1 %vm815_vm1, %v1446_v54 }
 0x18d   :  { %3456 = vmatprep.mubr.msk.bf16.mxu1 %vm815_vm1, %v4715_v7 }
 0x194   :  { %3457 = vmatmul.mubr.msk.bf16.vlgmr.msra.gmra.mrb[0].mxu1 %vm815_vm1, %v4716_v22  ;;  %v2651_v22 = vpop.trf.xlu0 }
 0x195   :  { %3460 = vmatprep.mubr.msk.bf16.mxu1 %vm815_vm1, %v4717_v45  ;;  %3473 = vmatpush3.bf16.msra.mxu1 %v3787_v40 }
 0x196   :  { %3474 = vmatprep.subr.bf16.mxu1 %v3788_v14  ;;  %3576 = vmatprep.mubr.msk.bf16.mxu0 %vm815_vm1, %v2651_v22 }
 0x199   :  { %3475 = vmatpush3.bf16.msra.mxu1 %v3788_v14 }
 0x19a   :  { %3476 = vmatprep.subr.bf16.mxu1 %v3789_v35 }
 0x19c   :  { %3461 = vmatmul.mubr.msk.bf16.gmra.mrb[4].mxu1 %vm815_vm1, %v1636_v6 }
 0x19d   :  { %3464 = vmatprep.mubr.msk.bf16.mxu1 %vm815_vm1, %v1637_v31  ;;  %3477 = vmatpush3.bf16.msra.mxu1 %v3789_v35  ;;  %v4668_v35 = vld [vmem:[%s4713_s4] ss:$0 sm:$0xff]  ;;  %s3828_s4 = smov [#allocation3]  }
 0x19e   :  { %3478 = vmatprep.subr.bf16.mxu1 %v3790_v42  ;;  %s2867_s26 = sshll.u32 %s3828_s4, 4  ;;  %s2868_s26 = int_to_ptr.vmem [resolvable:$true] %s2867_s26 }
 0x19f   :  { %s3803_s27 = scalar_lea.vmem %s2868_s26, 2048  ;;  %p3808_p1 = scmp.lt.s32.totalorder %s2868_s26, %s2868_s26 }
 0x1a0   :  { %p3804_p0 = scmp.ne.s32.totalorder %s2868_s26, %s3803_s27  ;;  %p3809_p2 = scmp.lt.s32.totalorder %s3803_s27, %s3803_s27 }
 0x1a1   :  { %3479 = vmatpush3.bf16.msra.mxu1 %v3790_v42 }
 0x1a2   :  { %3496 = vmatprep.subr.bf16.mxu1 %v3791_v11  ;;  %p3810_p3 = por %p3809_p2, %p3808_p1 }
 0x1a4   :  { %3465 = vmatmul.mubr.msk.bf16.gmra.mrb[8].mxu1 %vm815_vm1, %v1638_v52  ;;  %p3811_p4 = pnand %p3810_p3, %p3804_p0 }
 0x1a5   :  { %3468 = vmatprep.mubr.msk.bf16.mxu1 %vm815_vm1, %v1639_v55 }
 0x1ac   :  { %3469 = vmatmul.mubr.msk.bf16.gmra.mrb[12].mxu1 %vm815_vm1, %v1640_v46 }
 0x1ad   :  { %3480 = vmatprep.mubr.msk.bf16.mxu1 %vm815_vm1, %v4718_v37 }
 0x1b4   :  { %3481 = vmatmul.mubr.msk.bf16.vlgmr.msra.gmra.mrb[0].mxu1 %vm815_vm1, %v4719_v38 }
 0x1b5   :  { %3484 = vmatprep.mubr.msk.bf16.mxu1 %vm815_vm1, %v4720_v18  ;;  %3497 = vmatpush3.bf16.msra.mxu1 %v3791_v11 }
 0x1b6   :  { %3498 = vmatprep.subr.bf16.mxu1 %v3792_v36 }
 0x1b9   :  { %3499 = vmatpush3.bf16.msra.mxu1 %v3792_v36 }
 0x1ba   :  { %3500 = vmatprep.subr.bf16.mxu1 %v3793_v23 }
 0x1bc   :  { %3485 = vmatmul.mubr.msk.bf16.gmra.mrb[4].mxu1 %vm815_vm1, %v1830_v13 }
 0x1bd   :  { %3488 = vmatprep.mubr.msk.bf16.mxu1 %vm815_vm1, %v1831_v25  ;;  %3501 = vmatpush3.bf16.msra.mxu1 %v3793_v23  ;;  %v3799_v25 = vld [vmem:[%s4712_s3 + $0x100] sm:$0xff]  }
 0x1be   :  { %3502 = vmatprep.subr.bf16.mxu1 %v3794_v44 }
 0x1c1   :  { %3503 = vmatpush3.bf16.msra.mxu1 %v3794_v44 }
 0x1c2   :  { %3520 = vmatprep.subr.bf16.mxu1 %v3795_v32 }
 0x1c4   :  { %3489 = vmatmul.mubr.msk.bf16.gmra.mrb[8].mxu1 %vm815_vm1, %v1832_v26  ;;  %v2021_v26 = vld [vmem:[#allocation2 + $0x130] sm:$0xff] }
 0x1c5   :  { %3492 = vmatprep.mubr.msk.bf16.mxu1 %vm815_vm1, %v1833_v49  ;;  %v2029_v10 = vpack.c.bf16 %v2021_v26, %v4492_v48  ;;  %v3802_v49 = vld [vmem:[%s4712_s3 + $0x118] sm:$0xff]  }
 0x1cc   :  { %3493 = vmatmul.mubr.msk.bf16.gmra.mrb[12].mxu1 %vm815_vm1, %v1834_v57 }
 0x1cd   :  { %3504 = vmatprep.mubr.msk.bf16.mxu1 %vm815_vm1, %v4449_v63 }
 0x1d4   :  { %3505 = vmatmul.mubr.msk.bf16.vlgmr.msra.gmra.mrb[0].mxu1 %vm815_vm1, %v4451_v2  ;;  %v2395_v2 = vld [vmem:[#allocation2 + $0x32] sm:$0xff] }
 0x1d5   :  { %3508 = vmatprep.mubr.msk.bf16.mxu1 %vm815_vm1, %v4468_v61  ;;  %3521 = vmatpush3.bf16.msra.mxu1 %v3795_v32  ;;  %v2396_v61 = vld [vmem:[#allocation2 + $0x42] sm:$0xff] }
 0x1d6   :  { %3522 = vmatprep.subr.bf16.mxu1 %v3796_v16 }
 0x1d9   :  { %3523 = vmatpush3.bf16.msra.mxu1 %v3796_v16 }
 0x1da   :  { %3524 = vmatprep.subr.bf16.mxu1 %v3797_v5 }
 0x1dc   :  { %3509 = vmatmul.mubr.msk.bf16.gmra.mrb[4].mxu1 %vm815_vm1, %v2025_v21 }
 0x1dd   :  { %3512 = vmatprep.mubr.msk.bf16.mxu1 %vm815_vm1, %v4482_v59  ;;  %3525 = vmatpush3.bf16.msra.mxu1 %v3797_v5 }
 0x1de   :  { %3526 = vmatprep.subr.bf16.mxu1 %v3798_v39 }
 0x1e1   :  { %3527 = vmatpush3.bf16.msra.mxu1 %v3798_v39 }
 0x1e2   :  { %3544 = vmatprep.subr.bf16.mxu1 %v3799_v25 }
 0x1e4   :  { %3513 = vmatmul.mubr.msk.bf16.gmra.mrb[8].mxu1 %vm815_vm1, %v4484_v53 }
 0x1e5   :  { %3516 = vmatprep.mubr.msk.bf16.mxu1 %vm815_vm1, %v4494_v12 }
 0x1ec   :  { %3517 = vmatmul.mubr.msk.bf16.gmra.mrb[12].mxu1 %vm815_vm1, %v2029_v10 }
 0x1ed   :  { %3528 = vmatprep.mubr.msk.bf16.mxu1 %vm815_vm1, %v4190_v30  ;;  %v2219_v30 = vpack.c.bf16 %v2207_v0, %v4518_v43 }
 0x1f4   :  { %3529 = vmatmul.mubr.msk.bf16.vlgmr.msra.gmra.mrb[0].mxu1 %vm815_vm1, %v4232_v51  ;;  %v2215_v51 = vld [vmem:[#allocation2 + $0x131] sm:$0xff] }
 0x1f5   :  { %3532 = vmatprep.mubr.msk.bf16.mxu1 %vm815_vm1, %v4252_v56  ;;  %3545 = vmatpush3.bf16.msra.mxu1 %v3799_v25  ;;  %v2394_v56 = vld [vmem:[#allocation2 + $0x22] sm:$0xff]  ;;  %v2223_v63 = vpack.c.bf16 %v2215_v51, %v4538_v15 }
 0x1f6   :  { %3546 = vmatprep.subr.bf16.mxu1 %v3800_v27  ;;  %v2410_v9 = vpack.c.bf16 %v2395_v2, %v2394_v56 }
 0x1f9   :  { %3547 = vmatpush3.bf16.msra.mxu1 %v3800_v27 }
 0x1fa   :  { %3548 = vmatprep.subr.bf16.mxu1 %v3801_v29 }
 0x1fc   :  { %3533 = vmatmul.mubr.msk.bf16.gmra.mrb[4].mxu1 %vm815_vm1, %v2219_v30 }
 0x1fd   :  { %3536 = vmatprep.mubr.msk.bf16.mxu1 %vm815_vm1, %v4393_v24  ;;  %3549 = vmatpush3.bf16.msra.mxu1 %v3801_v29  ;;  %v2397_v24 = vld [vmem:[#allocation2 + $0x52] sm:$0xff] }
 0x1fe   :  { %3550 = vmatprep.subr.bf16.mxu1 %v3802_v49  ;;  %v2411_v40 = vpack.c.bf16 %v2397_v24, %v2396_v61 }
 0x201   :  { %3551 = vmatpush3.bf16.msra.mxu1 %v3802_v49 }
 0x204   :  { %3537 = vmatmul.mubr.msk.bf16.gmra.mrb[8].mxu1 %vm815_vm1, %v4415_v33  ;;  %v2401_v33 = vld [vmem:[#allocation2 + $0x92] sm:$0xff] }
 0x205   :  { %3540 = vmatprep.mubr.msk.bf16.mxu1 %vm815_vm1, %v4435_v47  ;;  %v2413_v47 = vpack.c.bf16 %v2401_v33, %v4561_v28 }
 0x20c   :  { %3541 = vmatmul.mubr.msk.bf16.gmra.mrb[12].mxu1 %vm815_vm1, %v2223_v63 }
 0x20d   :  { %3552 = vmatprep.mubr.msk.bf16.mxu1 %vm815_vm1, %v2410_v9 }
 0x214   :  { %3553 = vmatmul.mubr.msk.bf16.vlgmr.msra.gmra.mrb[0].mxu1 %vm815_vm1, %v2411_v40 }
 0x215   :  { %3556 = vmatprep.mubr.msk.bf16.mxu1 %vm815_vm1, %v4256_v58 }
 0x21c   :  { %3557 = vmatmul.mubr.msk.bf16.gmra.mrb[4].mxu1 %vm815_vm1, %v2413_v47 }
 0x21d   :  { %3560 = vmatprep.mubr.msk.bf16.mxu1 %vm815_vm1, %v4397_v41 }
 0x224   :  { %3561 = vmatmul.mubr.msk.bf16.gmra.mrb[8].mxu1 %vm815_vm1, %v4419_v60 }
 0x225   :  { %3564 = vmatprep.mubr.msk.bf16.mxu1 %vm815_vm1, %v4439_v34 }
 0x22c   :  { %3565 = vmatmul.mubr.msk.bf16.gmra.mrb[12].mxu1 %vm815_vm1, %v2417_v62 }
 0x246   :  { %v3386_v58 = vpop.f32.mrb[64].mxu0 }
 0x247   :  { %v1166_v8 = vpop.f32.mrb[65].mxu0 }
 0x248   :  { %v3387_v3 = vpop.f32.mrb[66].mxu0 }
 0x249   :  { %v1169_v59 = vpop.f32.mrb[67].mxu0 }
 0x24e   :  { %v3390_v19 = vpop.f32.mrb[68].mxu0 }
 0x24f   :  { %v1182_v53 = vpop.f32.mrb[69].mxu0 }
 0x250   :  { %v3391_v17 = vpop.f32.mrb[70].mxu0 }
 0x251   :  { %v1185_v48 = vpop.f32.mrb[71].mxu0 }
 0x256   :  { %v3394_v41 = vpop.f32.mrb[72].mxu0 }
 0x257   :  { %v1198_v4 = vpop.f32.mrb[73].mxu0 }
 0x258   :  { %v3395_v12 = vpop.f32.mrb[74].mxu0 }
 0x259   :  { %v1201_v60 = vpop.f32.mrb[75].mxu0 }
 0x25e   :  { %v4656_v54 = vpop.f32.mrb[76].mxu0 }
 0x25f   :  { %v4658_v34 = vpop.f32.mrb[77].mxu0 }
 0x260   :  { %v4660_v7 = vpop.f32.mrb[78].mxu0 }
 0x261   :  { %v4662_v14 = vpop.f32.mrb[79].mxu0 }
 0x2e7   :  { %v3554_v45 = vpop.f32.mrb[0].mxu1 }
 0x2e8   :  { %v3600_v43 = vadd.f32 %v3554_v45, %v3386_v58  ;;  %v2509_v6 = vpop.f32.mrb[1].mxu1  ;;  %v2652_v58 = vpop.trf.xlu0 }
 0x2e9   :  { %v3601_v42 = vadd.f32 %v2509_v6, %v1166_v8  ;;  %v3555_v31 = vpop.f32.mrb[2].mxu1 }
 0x2ea   :  { %v2597_v11 = vadd.f32 %v3600_v43, %v4668_v35  ;;  %v3602_v52 = vadd.f32 %v3555_v31, %v3387_v3  ;;  %v2512_v55 = vpop.f32.mrb[3].mxu1 }
 0x2eb   :  { %v2595_v15 = vadd.f32 %v3601_v42, %v4668_v35  ;;  %v3603_v46 = vadd.f32 %v2512_v55, %v1169_v59  ;;  %v2760_v55 = vpop.trf.xlu1 }
 0x2ec   :  { %v2598_v37 = vadd.f32 %v3602_v52, %v4668_v35  ;;  %v2613_v38 = vmax.f32 %v2597_v11, 0.0  ;;  %v2653_v43 = vpop.trf.xlu0 }
 0x2ed   :  { %v2596_v36 = vadd.f32 %v3603_v46, %v4668_v35  ;;  %v2611_v23 = vmax.f32 %v2595_v15, 0.0 }
 0x2ee   :  { %v2614_v18 = vmax.f32 %v2598_v37, 0.0 }
 0x2ef   :  { %v2612_v28 = vmax.f32 %v2596_v36, 0.0  ;;  %v3558_v13 = vpop.f32.mrb[4].mxu1 }
 0x2f0   :  { %v3604_v44 = vadd.f32 %v3558_v13, %v3390_v19  ;;  %v2525_v32 = vpop.f32.mrb[5].mxu1  ;;  %v2636_v50 = vpack.c.bf16 %v2614_v18, %v2613_v38  ;;  %v2654_v38 = vpop.trf.xlu0 }
 0x2f1   :  { %v3605_v57 = vadd.f32 %v2525_v32, %v1182_v53  ;;  %v3559_v16 = vpop.f32.mrb[6].mxu1  ;;  %v2635_v5 = vpack.c.bf16 %v2612_v28, %v2611_v23  ;;  %v2761_v18 = vpop.trf.xlu1 }
 0x2f2   :  { %v2601_v20 = vadd.f32 %v3604_v44, %v4668_v35  ;;  %v3606_v21 = vadd.f32 %v3559_v16, %v3391_v17  ;;  %v2528_v39 = vpop.f32.mrb[7].mxu1 }
 0x2f3   :  { %v2599_v25 = vadd.f32 %v3605_v57, %v4668_v35  ;;  %v3607_v26 = vadd.f32 %v2528_v39, %v1185_v48  ;;  %3568 = vmatprep.subr.bf16.mxu0 %v2635_v5 }
 0x2f4   :  { %v2602_v10 = vadd.f32 %v3606_v21, %v4668_v35  ;;  %3569 = vmatpush3.bf16.msra.mxu0 %v2635_v5  ;;  %v2617_v29 = vmax.f32 %v2601_v20, 0.0 }
 0x2f5   :  { %v2600_v27 = vadd.f32 %v3607_v26, %v4668_v35  ;;  %3570 = vmatprep.subr.bf16.mxu0 %v2636_v50  ;;  %v2615_v30 = vmax.f32 %v2599_v25, 0.0 }
 0x2f6   :  { %v2618_v0 = vmax.f32 %v2602_v10, 0.0 }
 0x2f7   :  { %v2616_v49 = vmax.f32 %v2600_v27, 0.0  ;;  %v3562_v51 = vpop.f32.mrb[8].mxu1 }
 0x2f8   :  { %v3608_v56 = vadd.f32 %v3562_v51, %v3394_v41  ;;  %v2541_v63 = vpop.f32.mrb[9].mxu1  ;;  %3571 = vmatpush3.bf16.msra.mxu0 %v2636_v50  ;;  %v2638_v2 = vpack.c.bf16 %v2618_v0, %v2617_v29 }
 0x2f9   :  { %v3609_v9 = vadd.f32 %v2541_v63, %v1198_v4  ;;  %v3563_v24 = vpop.f32.mrb[10].mxu1  ;;  %v2637_v61 = vpack.c.bf16 %v2616_v49, %v2615_v30 }
 0x2fa   :  { %v2605_v40 = vadd.f32 %v3608_v56, %v4668_v35  ;;  %v3610_v33 = vadd.f32 %v3563_v24, %v3395_v12  ;;  %v2544_v47 = vpop.f32.mrb[11].mxu1 }
 0x2fb   :  { %v2603_v1 = vadd.f32 %v3609_v9, %v4668_v35  ;;  %v3611_v62 = vadd.f32 %v2544_v47, %v1201_v60  ;;  %3572 = vmatprep.subr.bf16.mxu0 %v2637_v61 }
 0x2fc   :  { %v2606_v8 = vadd.f32 %v3610_v33, %v4668_v35  ;;  %3573 = vmatpush3.bf16.msra.mxu0 %v2637_v61  ;;  %v2621_v59 = vmax.f32 %v2605_v40, 0.0 }
 0x2fd   :  { %v2604_v3 = vadd.f32 %v3611_v62, %v4668_v35  ;;  %3574 = vmatprep.subr.bf16.mxu0 %v2638_v2  ;;  %v2619_v53 = vmax.f32 %v2603_v1, 0.0 }
 0x2fe   :  { %v2622_v19 = vmax.f32 %v2606_v8, 0.0 }
 0x2ff   :  { %v2620_v17 = vmax.f32 %v2604_v3, 0.0  ;;  %v3566_v48 = vpop.f32.mrb[12].mxu1 }
 0x300   :  { %v3612_v41 = vadd.f32 %v3566_v48, %v4656_v54  ;;  %v2557_v4 = vpop.f32.mrb[13].mxu1  ;;  %3575 = vmatpush3.bf16.msra.mxu0 %v2638_v2  ;;  %v2640_v12 = vpack.c.bf16 %v2622_v19, %v2621_v59 }
 0x301   :  { %v3613_v60 = vadd.f32 %v2557_v4, %v4658_v34  ;;  %v3567_v22 = vpop.f32.mrb[14].mxu1  ;;  %v2639_v45 = vpack.c.bf16 %v2620_v17, %v2619_v53 }
 0x302   :  { %v2609_v6 = vadd.f32 %v3612_v41, %v4668_v35  ;;  %v3614_v42 = vadd.f32 %v3567_v22, %v4660_v7  ;;  %v2560_v31 = vpop.f32.mrb[15].mxu1 }
 0x303   :  { %v2607_v11 = vadd.f32 %v3613_v60, %v4668_v35  ;;  %v3615_v52 = vadd.f32 %v2560_v31, %v4662_v14  ;;  %3584 = vmatprep.subr.bf16.mxu0 %v2639_v45  ;;  %3577 = vmatmul.mubr.msk.bf16.vlgmr.msra.gmra.mrb[80].mxu0 %vm815_vm1, %v2652_v58 }
 0x304   :  { %v2610_v54 = vadd.f32 %v3614_v42, %v4668_v35  ;;  %3585 = vmatpush3.bf16.msra.mxu0 %v2639_v45  ;;  %3580 = vmatprep.mubr.msk.bf16.mxu0 %vm815_vm1, %v2653_v43  ;;  %v2625_v15 = vmax.f32 %v2609_v6, 0.0 }
 0x305   :  { %v2608_v34 = vadd.f32 %v3615_v52, %v4668_v35  ;;  %3586 = vmatprep.subr.bf16.mxu0 %v2640_v12  ;;  %v2623_v7 = vmax.f32 %v2607_v11, 0.0  ;;  %v2762_v35 = vpop.trf.xlu1 }
 0x306   :  { %v2626_v46 = vmax.f32 %v2610_v54, 0.0 }
 0x307   :  { %v2624_v37 = vmax.f32 %v2608_v34, 0.0 }
 0x308   :  { %3587 = vmatpush3.bf16.msra.mxu0 %v2640_v12  ;;  %v2642_v36 = vpack.c.bf16 %v2626_v46, %v2625_v15 }
 0x309   :  { %v2641_v14 = vpack.c.bf16 %v2624_v37, %v2623_v7  ;;  %v2763_v23 = vpop.trf.xlu1 }
 0x30b   :  { %3588 = vmatprep.subr.bf16.mxu0 %v2641_v14  ;;  %3581 = vmatmul.mubr.msk.bf16.gmra.mrb[84].mxu0 %vm815_vm1, %v2654_v38 }
 0x30c   :  { %3589 = vmatpush3.bf16.msra.mxu0 %v2641_v14  ;;  %3592 = vmatprep.mubr.msk.bf16.mxu0 %vm815_vm1, %v2760_v55 }
 0x30d   :  { %3590 = vmatprep.subr.bf16.mxu0 %v2642_v36 }
 0x310   :  { %3591 = vmatpush3.bf16.msra.mxu0 %v2642_v36 }
 0x313   :  { %3593 = vmatmul.mubr.msk.bf16.vlgmr.msra.gmra.mrb[88].mxu0 %vm815_vm1, %v2761_v18 }
 0x314   :  { %3596 = vmatprep.mubr.msk.bf16.mxu0 %vm815_vm1, %v2762_v35 }
 0x31b   :  { %3597 = vmatmul.mubr.msk.bf16.gmra.mrb[92].mxu0 %vm815_vm1, %v2763_v23 }
 0x3d6   :  { %v3578_v28 = vpop.f32.mrb[80].mxu0 }
 0x3d7   :  { %v2738_v13 = vmul.f32 0.00390625, %v3578_v28  ;;  %v2705_v44 = vpop.f32.mrb[81].mxu0 }
 0x3d8   :  { %v2736_v32 = vmul.f32 0.00390625, %v2705_v44  ;;  %v3579_v50 = vpop.f32.mrb[82].mxu0 }
 0x3d9   :  { %2746 = vst [vmem:[#allocation3 + $0x10] sm:$0xff] %v2738_v13  ;;  %v2739_v57 = vmul.f32 0.00390625, %v3579_v50  ;;  %v2708_v16 = vpop.f32.mrb[83].mxu0 }
 0x3da   :  { %2744 = vst [vmem:[#allocation3] sm:$0xff] %v2736_v32  ;;  %v2737_v5 = vmul.f32 0.00390625, %v2708_v16 }
 0x3db   :  { %2747 = vst [vmem:[#allocation3 + $0x18] sm:$0xff] %v2739_v57 }
 0x3dc   :  { %2745 = vst [vmem:[#allocation3 + $0x8] sm:$0xff] %v2737_v5 }
 0x3de   :  { %v3582_v20 = vpop.f32.mrb[84].mxu0 }
 0x3df   :  { %v2742_v21 = vmul.f32 0.00390625, %v3582_v20  ;;  %v2721_v39 = vpop.f32.mrb[85].mxu0 }
 0x3e0   :  { %v2740_v25 = vmul.f32 0.00390625, %v2721_v39  ;;  %v3583_v26 = vpop.f32.mrb[86].mxu0 }
 0x3e1   :  { %2750 = vst [vmem:[#allocation3 + $0x30] sm:$0xff] %v2742_v21  ;;  %v2743_v10 = vmul.f32 0.00390625, %v3583_v26  ;;  %v2724_v27 = vpop.f32.mrb[87].mxu0 }
 0x3e2   :  { %2748 = vst [vmem:[#allocation3 + $0x20] sm:$0xff] %v2740_v25  ;;  %v2741_v29 = vmul.f32 0.00390625, %v2724_v27 }
 0x3e3   :  { %2751 = vst [vmem:[#allocation3 + $0x38] sm:$0xff] %v2743_v10 }
 0x3e4   :  { %2749 = vst [vmem:[#allocation3 + $0x28] sm:$0xff] %v2741_v29 }
 0x3e6   :  { %v3594_v0 = vpop.f32.mrb[88].mxu0 }
 0x3e7   :  { %v2847_v30 = vmul.f32 0.00390625, %v3594_v0  ;;  %v2814_v49 = vpop.f32.mrb[89].mxu0 }
 0x3e8   :  { %v2845_v51 = vmul.f32 0.00390625, %v2814_v49  ;;  %v3595_v56 = vpop.f32.mrb[90].mxu0 }
 0x3e9   :  { %2856 = vst [vmem:[#allocation3 + $0x50] sm:$0xff] %v2847_v30  ;;  %v2848_v63 = vmul.f32 0.00390625, %v3595_v56  ;;  %v2817_v2 = vpop.f32.mrb[91].mxu0 }
 0x3ea   :  { %2854 = vst [vmem:[#allocation3 + $0x40] sm:$0xff] %v2845_v51  ;;  %v2846_v9 = vmul.f32 0.00390625, %v2817_v2 }
 0x3eb   :  { %2857 = vst [vmem:[#allocation3 + $0x58] sm:$0xff] %v2848_v63 }
 0x3ec   :  { %2855 = vst [vmem:[#allocation3 + $0x48] sm:$0xff] %v2846_v9 }
 0x3ee   :  { %v3598_v24 = vpop.f32.mrb[92].mxu0 }
 0x3ef   :  { %v2851_v61 = vmul.f32 0.00390625, %v3598_v24  ;;  %v2830_v40 = vpop.f32.mrb[93].mxu0 }
 0x3f0   :  { %v2849_v33 = vmul.f32 0.00390625, %v2830_v40  ;;  %v3599_v47 = vpop.f32.mrb[94].mxu0 }
 0x3f1   :  { %2860 = vst [vmem:[#allocation3 + $0x70] sm:$0xff] %v2851_v61  ;;  %v2852_v1 = vmul.f32 0.00390625, %v3599_v47  ;;  %v2833_v62 = vpop.f32.mrb[95].mxu0 }
 0x3f2   :  { %2858 = vst [vmem:[#allocation3 + $0x60] sm:$0xff] %v2849_v33  ;;  %v2850_v58 = vmul.f32 0.00390625, %v2833_v62 }
 0x3f3   :  { %2861 = vst [vmem:[#allocation3 + $0x78] sm:$0xff] %v2852_v1 }
 0x3f4   :  { %2859 = vst [vmem:[#allocation3 + $0x68] sm:$0xff] %v2850_v58 }
 0x3f5   :  { %3814 = shalt.err (!%p3811_p4)
}
 0x3f6   :  { %s3815_s28 = scalar_lea.hbm %s4714_s5, 2048 }
 0x3f7   :  { %p3816_p5 = scmp.ne.s32.totalorder %s4714_s5, %s3815_s28  ;;  %p3819_p6 = scmp.lt.u32.totalorder %s3815_s28, %s4714_s5 }
 0x3f9   :  { %p3821_p7 = pnand %p3819_p6, %p3816_p5 }
 0x3fb   :  { %3824 = shalt.err (!%p3821_p7)
}
 0x3fc   :  { %s3829_s8 = smov 128   ;;  %s3830_s9 = smov 8  }
 0x3fd   :  { %2873 = dma.vmem_to_hbm [thread:$0]  %s2868_s26, 2048, %s4714_s5, [#allocation4], %s3829_s8, %s3829_s8, %s3830_s9  }
 0x3fe   :  { %3825 = dma.done.wait [#allocation4], 2048  }
 0x3ff   :  { %3826 = vsyncadd [#allocation4], 4294965248 }
 0x400   :  { %2877 = vsyncpa [#allocation4], 1 }

</bundles_post_ra>
